<compile_context>
chip_gen: v6e
topology: v6e:2x2x1
jax: 0.10.0
libtpu: 0.0.40
codegen_flags: <defaults>
</compile_context>

<pallas_src>
import math
from functools import partial

import jax
import jax.numpy as jnp
from jax.experimental import pallas as pl
from jax.experimental.pallas import tpu as pltpu


def _bf16_trunc(a):
    """Round to bf16-representable values but keep f32 storage.

    Makes every matmul's products exact on any backend (MXU bf16 passes, XLA CPU
    f32 dot, interpret mode), so kernel and reference agree to accumulation order.
    """
    return a.astype(jnp.bfloat16).astype(jnp.float32)


# ----------------------------------------------------------------------------- kernel
def _gated_sparse_attn_kernel(
    gidx_ref,                                   # SMEM (G,) int32  (scalar prefetch)
    x_ref,                                      # (1, L, E) f32
    wq_ref, wk_ref, wv_ref,                     # (H, E, Dh) f32 (bf16-truncated values)
    wo_ref,                                     # (H, Dh, E) f32 (bf16-truncated values)
    bq_ref, bk_ref, bv_ref,                     # (H, 1, Dh) f32
    bo_ref,                                     # (1, E) f32
    pos_ref,                                    # (L, L) f32
    o_ref,                                      # (1, L, E) f32
    *, num_heads, head_dim, tau, inv_scale, window_size, num_global,
):
    H, Dh = num_heads, head_dim
    L, E = x_ref.shape[1], x_ref.shape[2]

    x = _bf16_trunc(x_ref[0])                                 # (L, E)
    xb = jnp.broadcast_to(x[None], (H, L, E))                 # (H, L, E)

    # Batched per-head QKV projections (head-blocked weights -> no in-kernel reshape).
    q = jnp.einsum("hle,hed->hld", xb, wq_ref[...],
                   preferred_element_type=jnp.float32) + bq_ref[...]
    k = jnp.einsum("hle,hed->hld", xb, wk_ref[...],
                   preferred_element_type=jnp.float32) + bk_ref[...]
    v = jnp.einsum("hle,hed->hld", xb, wv_ref[...],
                   preferred_element_type=jnp.float32) + bv_ref[...]

    # All-head scores in one batched contraction.
    scores = jnp.einsum("hld,hmd->hlm", _bf16_trunc(q), _bf16_trunc(k),
                        preferred_element_type=jnp.float32) * inv_scale  # (H, L, L)

    # Sparsity pattern built in-kernel: local window OR global anchor rows/cols.
    row = jax.lax.broadcasted_iota(jnp.int32, (L, L), 0)
    col = jax.lax.broadcasted_iota(jnp.int32, (L, L), 1)
    allowed = jnp.abs(row - col) <= window_size
    for t in range(num_global):                               # static, tiny unroll
        g = gidx_ref[t]
        allowed = allowed | (row == g) | (col == g)

    # Threshold gate on raw scaled scores, then additive positional bias.
    keep = allowed[None] & (scores > tau)
    NEG = jnp.float32(-1e30)      # finite sentinel (finfo.min + pos_bias -> -inf/NaN)
    scores = jnp.where(keep, scores, NEG) + pos_ref[...][None]

    # Softmax with f32 statistics.
    m = jnp.max(scores, axis=-1, keepdims=True)
    e = jnp.exp(scores - m)
    denom = jnp.sum(e, axis=-1, keepdims=True)
    attn = e / denom
    # TODO(synk): nn.Dropout(p=0.1) on attn is training-only stochastic; identity here (eval mode).

    ctx = jnp.einsum("hlm,hmd->hld", _bf16_trunc(attn), _bf16_trunc(v),
                     preferred_element_type=jnp.float32)      # (H, L, Dh)

    # Output projection folded into the per-head contraction, accumulated over heads.
    y_h = jnp.einsum("hld,hde->hle", _bf16_trunc(ctx), wo_ref[...],
                     preferred_element_type=jnp.float32)      # (H, L, E)
    o_ref[0] = jnp.sum(y_h, axis=0) + bo_ref[...]             # lane-dense (L, E) store


# --------------------------------------------------------------------------- wrappers
def _prep_attention_params(params, num_heads, head_dim, global_indices):
    """Head-blocked weight layout (shared by kernel wrapper and reference)."""
    wq, bq, wk, bk, wv, bv, wo, bo = params
    E = wq.shape[0]
    H, Dh = num_heads, head_dim

    def split_out_heads(w):     # (E_in, E_out) pre-transposed -> (H, E_in, Dh)
        return _bf16_trunc(w.reshape(E, H, Dh).transpose(1, 0, 2))

    wq_h, wk_h, wv_h = split_out_heads(wq), split_out_heads(wk), split_out_heads(wv)
    wo_h = _bf16_trunc(wo.reshape(H, Dh, E))                  # rows grouped per head
    bq_h = bq.reshape(H, 1, Dh)
    bk_h = bk.reshape(H, 1, Dh)
    bv_h = bv.reshape(H, 1, Dh)
    bo_r = bo.reshape(1, E)

    # torch buffer semantics: numel()==1 (0 or 1 indices) -> anchor index 0.
    if len(global_indices) <= 1:
        g_idx = jnp.array([0], dtype=jnp.int32)
    else:
        g_idx = jnp.asarray(list(global_indices), dtype=jnp.int32)
    return wq_h, wk_h, wv_h, wo_h, bq_h, bk_h, bv_h, bo_r, g_idx


def gated_sparse_attention(x, pos_bias, params, *, num_heads, window_size,
                           tau, global_indices):
    B, L, E = x.shape
    assert E % num_heads == 0
    Dh = E // num_heads
    inv_scale = 1.0 / math.sqrt(Dh)

    (wq_h, wk_h, wv_h, wo_h, bq_h, bk_h, bv_h, bo_r,
     g_idx) = _prep_attention_params(params, num_heads, Dh, global_indices)

    kernel = partial(_gated_sparse_attn_kernel,
                     num_heads=num_heads, head_dim=Dh, tau=tau,
                     inv_scale=inv_scale, window_size=window_size,
                     num_global=int(g_idx.shape[0]))

    def const3(shape):
        return pl.BlockSpec(shape, lambda b, gidx: (0, 0, 0))

    def const2(shape):
        return pl.BlockSpec(shape, lambda b, gidx: (0, 0))

    # Scoped VMEM limit from actual operand sizes (x2 for pipelining) + headroom.
    def _bytes(a):
        return int(a.size) * a.dtype.itemsize
    const_bytes = sum(_bytes(a) for a in
                      (wq_h, wk_h, wv_h, wo_h, bq_h, bk_h, bv_h, bo_r, pos_bias))
    tile_bytes = L * E * 4                                    # x tile / out tile (f32)
    vmem_limit = int(2 * (const_bytes + 2 * tile_bytes) + (8 << 20))

    return pl.pallas_call(
        kernel,
        out_shape=jax.ShapeDtypeStruct((B, L, E), jnp.float32),
        grid_spec=pltpu.PrefetchScalarGridSpec(
            num_scalar_prefetch=1,                            # global-index vector -> SMEM
            grid=(B,),
            in_specs=[
                pl.BlockSpec((1, L, E), lambda b, gidx: (b, 0, 0)),   # x
                const3((num_heads, E, Dh)),                           # Wq
                const3((num_heads, E, Dh)),                           # Wk
                const3((num_heads, E, Dh)),                           # Wv
                const3((num_heads, Dh, E)),                           # Wo
                const3((num_heads, 1, Dh)),                           # bq
                const3((num_heads, 1, Dh)),                           # bk
                const3((num_heads, 1, Dh)),                           # bv
                const2((1, E)),                                       # bo
                const2((L, L)),                                       # pos_bias
            ],
            out_specs=pl.BlockSpec((1, L, E), lambda b, gidx: (b, 0, 0)),
        ),
        compiler_params=pltpu.CompilerParams(
            dimension_semantics=("parallel",),
            vmem_limit_bytes=vmem_limit),
    )(g_idx, x, wq_h, wk_h, wv_h, wo_h, bq_h, bk_h, bv_h, bo_r, pos_bias)


# ------------------------------------------------------------------- reference / glue
def build_tpe_bias(seq_len, *, sigma=None, period=401, bias_strength=0.3):
    """JAX port of the module's T-PE bias: B = B_gauss + B_periodic."""
    idx = jnp.arange(seq_len)
    d = jnp.abs(idx[None, :] - idx[:, None])
    sigma = sigma or period / 2
    gauss = jnp.exp(-(d.astype(jnp.float32) ** 2) / (2.0 * sigma ** 2))
    periodic = bias_strength * (d % period == 0).astype(jnp.float32)
    return gauss + periodic


def _reference(x, pos_bias, params, *, num_heads, window_size, tau, global_indices):
    """Pure-JAX forward with the same truncation / f32-accumulate choices as the
    kernel (the tau gate is a hard threshold, so score precision must match)."""
    B, L, E = x.shape
    H = num_heads
    Dh = E // H
    inv_scale = 1.0 / math.sqrt(Dh)
    (wq_h, wk_h, wv_h, wo_h, bq_h, bk_h, bv_h, bo_r,
     g_idx) = _prep_attention_params(params, H, Dh, global_indices)

    xb = jnp.broadcast_to(_bf16_trunc(x)[:, None], (B, H, L, E))
    q = jnp.einsum("bhle,hed->bhld", xb, wq_h,
                   preferred_element_type=jnp.float32) + bq_h[None]
    k = jnp.einsum("bhle,hed->bhld", xb, wk_h,
                   preferred_element_type=jnp.float32) + bk_h[None]
    v = jnp.einsum("bhle,hed->bhld", xb, wv_h,
                   preferred_element_type=jnp.float32) + bv_h[None]

    scores = jnp.einsum("bhld,bhmd->bhlm", _bf16_trunc(q), _bf16_trunc(k),
                        preferred_element_type=jnp.float32) * inv_scale

    idx = jnp.arange(L)
    allowed = jnp.abs(idx[None, :] - idx[:, None]) <= window_size
    gmask = jnp.zeros((L,), dtype=bool).at[g_idx].set(True)
    allowed = allowed | gmask[:, None] | gmask[None, :]

    keep = allowed[None, None] & (scores > tau)
    scores = jnp.where(keep, scores, jnp.float32(-1e30)) + pos_bias[None, None]
    attn = jax.nn.softmax(scores, axis=-1)
    ctx = jnp.einsum("bhlm,bhmd->bhld", _bf16_trunc(attn), _bf16_trunc(v),
                     preferred_element_type=jnp.float32)
    y_h = jnp.einsum("bhld,hde->bhle", _bf16_trunc(ctx), wo_h,
                     preferred_element_type=jnp.float32)
    return jnp.sum(y_h, axis=1) + bo_r


def _init_params(key, embed_dim):
    """nn.Linear-style init; weights stored pre-transposed (in_dim, out_dim)."""
    ks = jax.random.split(key, 8)
    s = 1.0 / math.sqrt(embed_dim)
    wq = jax.random.uniform(ks[0], (embed_dim, embed_dim), jnp.float32, -s, s)
    bq = jax.random.uniform(ks[1], (embed_dim,), jnp.float32, -s, s)
    wk = jax.random.uniform(ks[2], (embed_dim, embed_dim), jnp.float32, -s, s)
    bk = jax.random.uniform(ks[3], (embed_dim,), jnp.float32, -s, s)
    wv = jax.random.uniform(ks[4], (embed_dim, embed_dim), jnp.float32, -s, s)
    bv = jax.random.uniform(ks[5], (embed_dim,), jnp.float32, -s, s)
    wo = jax.random.uniform(ks[6], (embed_dim, embed_dim), jnp.float32, -s, s)
    bo = jax.random.uniform(ks[7], (embed_dim,), jnp.float32, -s, s)
    return (wq, bq, wk, bk, wv, bv, wo, bo)


# TODO(synk): MultiTaskModel's conv embedding / BatchNorm / PositionalEncoding /
# LayerNorm / FFN / classifier+regressor heads are plain dense XLA ops and are not
# kernelized here; this kernel covers the GatedSparseAttention hot path.

if __name__ == "__main__":
    # Small shapes consistent with the module: batch=2, seq=8, embed_dim=128
    # (multiple of 128 -> lane-dense output stores), 4 heads.
    B, L, E, H = 2, 8, 128, 4
    window_size, tau, global_indices = 2, 0.0, (0,)

    key = jax.random.PRNGKey(0)
    kx, kw = jax.random.split(key, 2)
    x = jax.random.normal(kx, (B, L, E), dtype=jnp.float32)
    pos_bias = build_tpe_bias(L, sigma=2.0, period=4, bias_strength=0.3)
    params = _init_params(kw, E)

    out = gated_sparse_attention(
        x, pos_bias, params, num_heads=H, window_size=window_size,
        tau=tau, global_indices=global_indices)
    out = jax.block_until_ready(out)

    ref = _reference(x, pos_bias, params, num_heads=H,
                     window_size=window_size, tau=tau,
                     global_indices=global_indices)
    ref = jax.block_until_ready(ref)
    assert out.shape == (B, L, E)
    assert jnp.allclose(out, ref, atol=5e-3, rtol=5e-3), "mismatch vs reference"
    print("KERNEL_OK")
</pallas_src>

<mosaic_0001>
module attributes {stable_mosaic.version = 11 : i64} {
  func.func @_gated_sparse_attn_kernel(%arg0: i32, %arg1: memref<1xi32, #tpu.memory_space<smem>>, %arg2: memref<1x8x128xf32, #tpu.memory_space<vmem>>, %arg3: memref<4x128x32xf32, #tpu.memory_space<vmem>>, %arg4: memref<4x128x32xf32, #tpu.memory_space<vmem>>, %arg5: memref<4x128x32xf32, #tpu.memory_space<vmem>>, %arg6: memref<4x32x128xf32, #tpu.memory_space<vmem>>, %arg7: memref<4x1x32xf32, #tpu.memory_space<vmem>>, %arg8: memref<4x1x32xf32, #tpu.memory_space<vmem>>, %arg9: memref<4x1x32xf32, #tpu.memory_space<vmem>>, %arg10: memref<1x128xf32, #tpu.memory_space<vmem>>, %arg11: memref<8x8xf32, #tpu.memory_space<vmem>>, %arg12: memref<1x8x128xf32, #tpu.memory_space<vmem>>) attributes {dimension_semantics = [#tpu.dimension_semantics<parallel>], iteration_bounds = array<i64: 2>, scalar_prefetch = 1 : i64, scratch_operands = 0 : i64, tpu.core_type = #tpu.core_type<tc>, window_params = [{transform_indices = @transform_0, window_bounds = array<i64: 1, 8, 128>}, {pipeline_mode = #tpu.pipeline_mode<synchronous>, transform_indices = @transform_1, window_bounds = array<i64: 4, 128, 32>}, {pipeline_mode = #tpu.pipeline_mode<synchronous>, transform_indices = @transform_2, window_bounds = array<i64: 4, 128, 32>}, {pipeline_mode = #tpu.pipeline_mode<synchronous>, transform_indices = @transform_3, window_bounds = array<i64: 4, 128, 32>}, {pipeline_mode = #tpu.pipeline_mode<synchronous>, transform_indices = @transform_4, window_bounds = array<i64: 4, 32, 128>}, {pipeline_mode = #tpu.pipeline_mode<synchronous>, transform_indices = @transform_5, window_bounds = array<i64: 4, 1, 32>}, {pipeline_mode = #tpu.pipeline_mode<synchronous>, transform_indices = @transform_6, window_bounds = array<i64: 4, 1, 32>}, {pipeline_mode = #tpu.pipeline_mode<synchronous>, transform_indices = @transform_7, window_bounds = array<i64: 4, 1, 32>}, {pipeline_mode = #tpu.pipeline_mode<synchronous>, transform_indices = @transform_8, window_bounds = array<i64: 1, 128>}, {pipeline_mode = #tpu.pipeline_mode<synchronous>, transform_indices = @transform_9, window_bounds = array<i64: 8, 8>}, {transform_indices = @transform_10, window_bounds = array<i64: 1, 8, 128>}]} {
    %c0 = arith.constant 0 : index
    %c0_0 = arith.constant 0 : index
    %c0_1 = arith.constant 0 : index
    %0 = vector.load %arg2[%c0, %c0_0, %c0_1] : memref<1x8x128xf32, #tpu.memory_space<vmem>>, vector<1x8x128xf32>
    %1 = vector.shape_cast %0 : vector<1x8x128xf32> to vector<8x128xf32>
    %2 = arith.truncf %1 : vector<8x128xf32> to vector<8x128xbf16>
    %3 = arith.extf %2 : vector<8x128xbf16> to vector<8x128xf32>
    %4 = vector.shape_cast %3 : vector<8x128xf32> to vector<1x8x128xf32>
    %5 = vector.shape_cast %4 : vector<1x8x128xf32> to vector<1x8x128xf32>
    %6 = vector.broadcast %5 : vector<1x8x128xf32> to vector<4x8x128xf32>
    %c0_2 = arith.constant 0 : index
    %c0_3 = arith.constant 0 : index
    %c0_4 = arith.constant 0 : index
    %7 = vector.load %arg3[%c0_2, %c0_3, %c0_4] : memref<4x128x32xf32, #tpu.memory_space<vmem>>, vector<4x128x32xf32>
    "tpu.trace_start"() <{level = 10 : i32, message = "hle,hed->hld"}> : () -> ()
    %cst = arith.constant dense<0.000000e+00> : vector<4x8x32xf32>
    %8 = tpu.matmul %6, %7, %cst {dimension_numbers = #tpu.dot_dimension_numbers<[2], [1], [1], [2], [0, 0, 0, 1, 1, 2], [0], [0]>} : vector<4x8x128xf32>, vector<4x128x32xf32>, vector<4x8x32xf32> -> vector<4x8x32xf32>
    "tpu.trace_stop"() : () -> ()
    %c0_5 = arith.constant 0 : index
    %c0_6 = arith.constant 0 : index
    %c0_7 = arith.constant 0 : index
    %9 = vector.load %arg7[%c0_5, %c0_6, %c0_7] : memref<4x1x32xf32, #tpu.memory_space<vmem>>, vector<4x1x32xf32>
    %10 = vector.broadcast %9 : vector<4x1x32xf32> to vector<4x8x32xf32>
    %11 = arith.addf %8, %10 : vector<4x8x32xf32>
    %c0_8 = arith.constant 0 : index
    %c0_9 = arith.constant 0 : index
    %c0_10 = arith.constant 0 : index
    %12 = vector.load %arg4[%c0_8, %c0_9, %c0_10] : memref<4x128x32xf32, #tpu.memory_space<vmem>>, vector<4x128x32xf32>
    "tpu.trace_start"() <{level = 10 : i32, message = "hle,hed->hld"}> : () -> ()
    %cst_11 = arith.constant dense<0.000000e+00> : vector<4x8x32xf32>
    %13 = tpu.matmul %6, %12, %cst_11 {dimension_numbers = #tpu.dot_dimension_numbers<[2], [1], [1], [2], [0, 0, 0, 1, 1, 2], [0], [0]>} : vector<4x8x128xf32>, vector<4x128x32xf32>, vector<4x8x32xf32> -> vector<4x8x32xf32>
    "tpu.trace_stop"() : () -> ()
    %c0_12 = arith.constant 0 : index
    %c0_13 = arith.constant 0 : index
    %c0_14 = arith.constant 0 : index
    %14 = vector.load %arg8[%c0_12, %c0_13, %c0_14] : memref<4x1x32xf32, #tpu.memory_space<vmem>>, vector<4x1x32xf32>
    %15 = vector.broadcast %14 : vector<4x1x32xf32> to vector<4x8x32xf32>
    %16 = arith.addf %13, %15 : vector<4x8x32xf32>
    %c0_15 = arith.constant 0 : index
    %c0_16 = arith.constant 0 : index
    %c0_17 = arith.constant 0 : index
    %17 = vector.load %arg5[%c0_15, %c0_16, %c0_17] : memref<4x128x32xf32, #tpu.memory_space<vmem>>, vector<4x128x32xf32>
    "tpu.trace_start"() <{level = 10 : i32, message = "hle,hed->hld"}> : () -> ()
    %cst_18 = arith.constant dense<0.000000e+00> : vector<4x8x32xf32>
    %18 = tpu.matmul %6, %17, %cst_18 {dimension_numbers = #tpu.dot_dimension_numbers<[2], [1], [1], [2], [0, 0, 0, 1, 1, 2], [0], [0]>} : vector<4x8x128xf32>, vector<4x128x32xf32>, vector<4x8x32xf32> -> vector<4x8x32xf32>
    "tpu.trace_stop"() : () -> ()
    %c0_19 = arith.constant 0 : index
    %c0_20 = arith.constant 0 : index
    %c0_21 = arith.constant 0 : index
    %19 = vector.load %arg9[%c0_19, %c0_20, %c0_21] : memref<4x1x32xf32, #tpu.memory_space<vmem>>, vector<4x1x32xf32>
    %20 = vector.broadcast %19 : vector<4x1x32xf32> to vector<4x8x32xf32>
    %21 = arith.addf %18, %20 : vector<4x8x32xf32>
    %22 = arith.truncf %11 : vector<4x8x32xf32> to vector<4x8x32xbf16>
    %23 = arith.extf %22 : vector<4x8x32xbf16> to vector<4x8x32xf32>
    %24 = arith.truncf %16 : vector<4x8x32xf32> to vector<4x8x32xbf16>
    %25 = arith.extf %24 : vector<4x8x32xbf16> to vector<4x8x32xf32>
    "tpu.trace_start"() <{level = 10 : i32, message = "hld,hmd->hlm"}> : () -> ()
    %cst_22 = arith.constant dense<0.000000e+00> : vector<4x8x8xf32>
    %26 = tpu.matmul %23, %25, %cst_22 {dimension_numbers = #tpu.dot_dimension_numbers<[2], [2], [1], [1], [0, 0, 0, 1, 1, 1], [0], [0]>} : vector<4x8x32xf32>, vector<4x8x32xf32>, vector<4x8x8xf32> -> vector<4x8x8xf32>
    "tpu.trace_stop"() : () -> ()
    %cst_23 = arith.constant 0.176776692 : f32
    %27 = vector.broadcast %cst_23 : f32 to vector<4x8x8xf32>
    %28 = arith.mulf %26, %27 : vector<4x8x8xf32>
    %29 = tpu.iota {dimensions = array<i32: 0>} : vector<8x8xi32>
    %30 = tpu.iota {dimensions = array<i32: 1>} : vector<8x8xi32>
    %31 = arith.subi %29, %30 : vector<8x8xi32>
    %32 = math.absi %31 : vector<8x8xi32>
    %c2_i32 = arith.constant 2 : i32
    %33 = vector.broadcast %c2_i32 : i32 to vector<8x8xi32>
    %34 = arith.cmpi sle, %32, %33 : vector<8x8xi32>
    %c0_24 = arith.constant 0 : index
    %35 = memref.load %arg1[%c0_24] : memref<1xi32, #tpu.memory_space<smem>>
    %36 = vector.broadcast %35 : i32 to vector<8x8xi32>
    %37 = arith.cmpi eq, %29, %36 : vector<8x8xi32>
    %38 = arith.ori %34, %37 : vector<8x8xi1>
    %39 = vector.broadcast %35 : i32 to vector<8x8xi32>
    %40 = arith.cmpi eq, %30, %39 : vector<8x8xi32>
    %41 = arith.ori %38, %40 : vector<8x8xi1>
    %42 = vector.shape_cast %41 : vector<8x8xi1> to vector<1x8x8xi1>
    %cst_25 = arith.constant 0.000000e+00 : f32
    %43 = vector.broadcast %cst_25 : f32 to vector<4x8x8xf32>
    %44 = arith.cmpf ogt, %28, %43 : vector<4x8x8xf32>
    %45 = vector.broadcast %42 : vector<1x8x8xi1> to vector<4x8x8xi1>
    %46 = arith.andi %45, %44 : vector<4x8x8xi1>
    %cst_26 = arith.constant -1.000000e+30 : f32
    %47 = vector.broadcast %cst_26 : f32 to vector<4x8x8xf32>
    %48 = arith.select %46, %28, %47 : vector<4x8x8xi1>, vector<4x8x8xf32>
    %c0_27 = arith.constant 0 : index
    %c0_28 = arith.constant 0 : index
    %49 = vector.load %arg11[%c0_27, %c0_28] : memref<8x8xf32, #tpu.memory_space<vmem>>, vector<8x8xf32>
    %50 = vector.shape_cast %49 : vector<8x8xf32> to vector<1x8x8xf32>
    %51 = vector.broadcast %50 : vector<1x8x8xf32> to vector<4x8x8xf32>
    %52 = arith.addf %48, %51 : vector<4x8x8xf32>
    %cst_29 = arith.constant dense<0xFF800000> : vector<4x8xf32>
    %53 = vector.multi_reduction <maximumf>, %52, %cst_29 [2] : vector<4x8x8xf32> to vector<4x8xf32>
    %54 = vector.shape_cast %53 : vector<4x8xf32> to vector<4x8x1xf32>
    %55 = vector.broadcast %54 : vector<4x8x1xf32> to vector<4x8x8xf32>
    %56 = arith.subf %52, %55 : vector<4x8x8xf32>
    %57 = math.exp %56 : vector<4x8x8xf32>
    %cst_30 = arith.constant dense<0.000000e+00> : vector<4x8xf32>
    %58 = vector.multi_reduction <add>, %57, %cst_30 [2] : vector<4x8x8xf32> to vector<4x8xf32>
    %59 = vector.shape_cast %58 : vector<4x8xf32> to vector<4x8x1xf32>
    %60 = vector.broadcast %59 : vector<4x8x1xf32> to vector<4x8x8xf32>
    %61 = arith.divf %57, %60 : vector<4x8x8xf32>
    %62 = arith.truncf %61 : vector<4x8x8xf32> to vector<4x8x8xbf16>
    %63 = arith.extf %62 : vector<4x8x8xbf16> to vector<4x8x8xf32>
    %64 = arith.truncf %21 : vector<4x8x32xf32> to vector<4x8x32xbf16>
    %65 = arith.extf %64 : vector<4x8x32xbf16> to vector<4x8x32xf32>
    "tpu.trace_start"() <{level = 10 : i32, message = "hlm,hmd->hld"}> : () -> ()
    %cst_31 = arith.constant dense<0.000000e+00> : vector<4x8x32xf32>
    %66 = tpu.matmul %63, %65, %cst_31 {dimension_numbers = #tpu.dot_dimension_numbers<[2], [1], [1], [2], [0, 0, 0, 1, 1, 2], [0], [0]>} : vector<4x8x8xf32>, vector<4x8x32xf32>, vector<4x8x32xf32> -> vector<4x8x32xf32>
    "tpu.trace_stop"() : () -> ()
    %67 = arith.truncf %66 : vector<4x8x32xf32> to vector<4x8x32xbf16>
    %68 = arith.extf %67 : vector<4x8x32xbf16> to vector<4x8x32xf32>
    %c0_32 = arith.constant 0 : index
    %c0_33 = arith.constant 0 : index
    %c0_34 = arith.constant 0 : index
    %69 = vector.load %arg6[%c0_32, %c0_33, %c0_34] : memref<4x32x128xf32, #tpu.memory_space<vmem>>, vector<4x32x128xf32>
    "tpu.trace_start"() <{level = 10 : i32, message = "hld,hde->hle"}> : () -> ()
    %cst_35 = arith.constant dense<0.000000e+00> : vector<4x8x128xf32>
    %70 = tpu.matmul %68, %69, %cst_35 {dimension_numbers = #tpu.dot_dimension_numbers<[2], [1], [1], [2], [0, 0, 0, 1, 1, 2], [0], [0]>} : vector<4x8x32xf32>, vector<4x32x128xf32>, vector<4x8x128xf32> -> vector<4x8x128xf32>
    "tpu.trace_stop"() : () -> ()
    %cst_36 = arith.constant dense<0.000000e+00> : vector<8x128xf32>
    %71 = vector.multi_reduction <add>, %70, %cst_36 [0] : vector<4x8x128xf32> to vector<8x128xf32>
    %c0_37 = arith.constant 0 : index
    %c0_38 = arith.constant 0 : index
    %72 = vector.load %arg10[%c0_37, %c0_38] : memref<1x128xf32, #tpu.memory_space<vmem>>, vector<1x128xf32>
    %73 = vector.broadcast %72 : vector<1x128xf32> to vector<8x128xf32>
    %74 = arith.addf %71, %73 : vector<8x128xf32>
    %c0_39 = arith.constant 0 : index
    %c0_40 = arith.constant 0 : index
    %c0_41 = arith.constant 0 : index
    %75 = vector.load %arg12[%c0_39, %c0_40, %c0_41] : memref<1x8x128xf32, #tpu.memory_space<vmem>>, vector<1x8x128xf32>
    %76 = vector.shape_cast %75 : vector<1x8x128xf32> to vector<8x128xf32>
    %77 = vector.shape_cast %74 : vector<8x128xf32> to vector<1x8x128xf32>
    tpu.vector_store %arg12[%c0_39, %c0_40, %c0_41], %77 {strides = array<i32>} : memref<1x8x128xf32, #tpu.memory_space<vmem>>, vector<1x8x128xf32>,
    return
  }
  func.func @transform_0(%arg0: i32, %arg1: memref<1xi32, #tpu.memory_space<smem>>) -> (i32, i32, i32) {
    %c0_i32 = arith.constant 0 : i32
    %c0_i32_0 = arith.constant 0 : i32
    %c0_i32_1 = arith.constant 0 : i32
    return %arg0, %c0_i32, %c0_i32_0 : i32, i32, i32
  }
  func.func @transform_1(%arg0: i32, %arg1: memref<1xi32, #tpu.memory_space<smem>>) -> (i32, i32, i32) {
    %c0_i32 = arith.constant 0 : i32
    %c0_i32_0 = arith.constant 0 : i32
    %c0_i32_1 = arith.constant 0 : i32
    %c0_i32_2 = arith.constant 0 : i32
    return %c0_i32, %c0_i32_0, %c0_i32_1 : i32, i32, i32
  }
  func.func @transform_2(%arg0: i32, %arg1: memref<1xi32, #tpu.memory_space<smem>>) -> (i32, i32, i32) {
    %c0_i32 = arith.constant 0 : i32
    %c0_i32_0 = arith.constant 0 : i32
    %c0_i32_1 = arith.constant 0 : i32
    %c0_i32_2 = arith.constant 0 : i32
    return %c0_i32, %c0_i32_0, %c0_i32_1 : i32, i32, i32
  }
  func.func @transform_3(%arg0: i32, %arg1: memref<1xi32, #tpu.memory_space<smem>>) -> (i32, i32, i32) {
    %c0_i32 = arith.constant 0 : i32
    %c0_i32_0 = arith.constant 0 : i32
    %c0_i32_1 = arith.constant 0 : i32
    %c0_i32_2 = arith.constant 0 : i32
    return %c0_i32, %c0_i32_0, %c0_i32_1 : i32, i32, i32
  }
  func.func @transform_4(%arg0: i32, %arg1: memref<1xi32, #tpu.memory_space<smem>>) -> (i32, i32, i32) {
    %c0_i32 = arith.constant 0 : i32
    %c0_i32_0 = arith.constant 0 : i32
    %c0_i32_1 = arith.constant 0 : i32
    %c0_i32_2 = arith.constant 0 : i32
    return %c0_i32, %c0_i32_0, %c0_i32_1 : i32, i32, i32
  }
  func.func @transform_5(%arg0: i32, %arg1: memref<1xi32, #tpu.memory_space<smem>>) -> (i32, i32, i32) {
    %c0_i32 = arith.constant 0 : i32
    %c0_i32_0 = arith.constant 0 : i32
    %c0_i32_1 = arith.constant 0 : i32
    %c0_i32_2 = arith.constant 0 : i32
    return %c0_i32, %c0_i32_0, %c0_i32_1 : i32, i32, i32
  }
  func.func @transform_6(%arg0: i32, %arg1: memref<1xi32, #tpu.memory_space<smem>>) -> (i32, i32, i32) {
    %c0_i32 = arith.constant 0 : i32
    %c0_i32_0 = arith.constant 0 : i32
    %c0_i32_1 = arith.constant 0 : i32
    %c0_i32_2 = arith.constant 0 : i32
    return %c0_i32, %c0_i32_0, %c0_i32_1 : i32, i32, i32
  }
  func.func @transform_7(%arg0: i32, %arg1: memref<1xi32, #tpu.memory_space<smem>>) -> (i32, i32, i32) {
    %c0_i32 = arith.constant 0 : i32
    %c0_i32_0 = arith.constant 0 : i32
    %c0_i32_1 = arith.constant 0 : i32
    %c0_i32_2 = arith.constant 0 : i32
    return %c0_i32, %c0_i32_0, %c0_i32_1 : i32, i32, i32
  }
  func.func @transform_8(%arg0: i32, %arg1: memref<1xi32, #tpu.memory_space<smem>>) -> (i32, i32) {
    %c0_i32 = arith.constant 0 : i32
    %c0_i32_0 = arith.constant 0 : i32
    %c0_i32_1 = arith.constant 0 : i32
    return %c0_i32, %c0_i32_0 : i32, i32
  }
  func.func @transform_9(%arg0: i32, %arg1: memref<1xi32, #tpu.memory_space<smem>>) -> (i32, i32) {
    %c0_i32 = arith.constant 0 : i32
    %c0_i32_0 = arith.constant 0 : i32
    %c0_i32_1 = arith.constant 0 : i32
    return %c0_i32, %c0_i32_0 : i32, i32
  }
  func.func @transform_10(%arg0: i32, %arg1: memref<1xi32, #tpu.memory_space<smem>>) -> (i32, i32, i32) {
    %c0_i32 = arith.constant 0 : i32
    %c0_i32_0 = arith.constant 0 : i32
    %c0_i32_1 = arith.constant 0 : i32
    return %arg0, %c0_i32, %c0_i32_0 : i32, i32, i32
  }
}

</mosaic_0001>

<bundles_post_ra>
// kernel: tpu_custom_call.1
= control target key start
LH: loop header
LB: loop body
LE: loop exit
PB: predicated region body
PF: predicated region fallthrough
CT: control target
= control target key end

     0   :  { %s4631_s0 = inlined_call_operand.<no memory space> [shape: s32[1], index: 0, kind: input, shape index: {}]   ;;  %s4632_s1 = inlined_call_operand.vmem [shape: f32[2,8,128], index: 1, kind: input, shape index: {}]   ;;  %s4633_s2 = inlined_call_operand.vmem [shape: f32[4,128,32], index: 2, kind: input, shape index: {}]   ;;  %s4634_s3 = inlined_call_operand.vmem [shape: f32[4,128,32], index: 3, kind: input, shape index: {}]   ;;  %s4635_s4 = inlined_call_operand.vmem [shape: f32[4,128,32], index: 4, kind: input, shape index: {}]   ;;  %s4636_s5 = inlined_call_operand.vmem [shape: f32[4,32,128], index: 5, kind: input, shape index: {}]   ;;  %s4637_s6 = inlined_call_operand.vmem [shape: f32[4,1,32], index: 6, kind: input, shape index: {}]   ;;  %s4638_s7 = inlined_call_operand.vmem [shape: f32[4,1,32], index: 7, kind: input, shape index: {}]   ;;  %s4639_s8 = inlined_call_operand.vmem [shape: f32[4,1,32], index: 8, kind: input, shape index: {}]   ;;  %s4640_s9 = inlined_call_operand.vmem [shape: f32[1,128], index: 9, kind: input, shape index: {}]   ;;  %s4641_s10 = inlined_call_operand.vmem [shape: f32[8,8], index: 10, kind: input, shape index: {}]   ;;  %s4642_s11 = inlined_call_operand.hbm [shape: f32[2,8,128], index: 11, kind: output, shape index: {}]  }
   0x1   :  { %4643 = sst [smem:[#allocation7_spill]] %s4632_s1 }
   0x2   :  { %16 = sst [smem:[#allocation3]] %s4631_s0 }
   0x3   :  { %17 = vsyncpa [#allocation5], 0 }
   0x4   :  { %19 = vsyncpa [#allocation5 + $0x1], 0  ;;  %s3558_s19 = smov 0   ;;  %s3560_s20 = smov 0  }
   0x5   :  { %s3562_s21 = smov 0   ;;  %s3564_s22 = smov 0  }
   0x6 LB: > { %s3579_s0 = sadd.s32 4294967295, %s3490_s22   ;;  %s2589_s23 = sadd.s32 4294967294, %s3490_s22   ;;  %s3490_s22 = sphi %s3564_s22, %s4652_s22   ;;  %s3486_s21 = sphi %s3562_s21, %s4651_s21   ;;  %s3482_s20 = sphi %s3560_s20, %s4650_s20   ;;  %s3478_s19 = sphi %s3558_s19, %s4649_s19  }
   0x7   : > { %s3583_s24 = sadd.s32 1, %s3490_s22   ;;  %s247_s25 = sadd.s32 1, %s3486_s21 }
   0x8   : > { %s244_s26 = ssub.s32 %s3490_s22, %s3583_s24  ;;  %p257_p0 = scmp.ne.s32.totalorder %s3486_s21, %s3482_s20 }
   0x9   : > { %p245_p1 = scmp.eq.s32.totalorder %s244_s26, 0  ;;  %p258_p2 = scmp.eq.s32.totalorder %s3579_s0, 1 }
   0xa   : > { %p263_p3 = scmp.ne.s32.totalorder %s3482_s20, %s3478_s19  ;;  %p264_p4 = scmp.eq.s32.totalorder %s2589_s23, 1 }
   0xb   : > { %s3594_s27 = scalar_select %p245_p1, %s3486_s21, %s247_s25  }
   0xc   : > { %p3596_p5 = por %p258_p2, %p257_p0  ;;  %p3600_p6 = por %p264_p4, %p263_p3 }
   0xd   : > { %p2592_p7 = scmp.ge.s32.totalorder %s3490_s22, 1  ;;  %p316_p8 = scmp.lt.s32.totalorder %s3490_s22, 3 }
   0xf   : > { %p317_p9 = pnand %p2592_p7, %p316_p8 }
  0x10   : > { %p353_p10 = scmp.lt.s32.totalorder (!%p317_p9), %s3579_s0, 1  ;;  %s4646_s1 = sld [smem:[#allocation7_spill]] (!%p317_p9) }
  0x11   : > { %320 = sbr.rel (%p317_p9) target bundleno = 1279 (0x4ff), region = 60  ;;  %s1810_s15 = sld [smem:[#allocation3]] (!%p317_p9) }
  0x12   : > { %s350_s23 = sand.u32 (!%p317_p9), 1, %s3482_s20   ;;  %s2626_s14 = sshll.u32 (!%p317_p9), %s3579_s0, 7 }
  0x13   : > { %s2528_s17 = scalar_lea.hbm (!%p317_p9), %s4642_s11, %s2626_s14  ;;  %s2517_s18 = scalar_lea.sflag (!%p317_p9), [#allocation5], %s350_s23 }
  0x14   : > { %s3494_s12 = smov (!%p317_p9), [#allocation4]  }
  0x15   : > { %s3434_s13 = sshll.u32 (!%p317_p9), %s3494_s12, 4  ;;  %s3435_s13 = int_to_ptr.vmem [resolvable:$false] %s3434_s13 }
  0x16   : > { %v375_v0 = vld [vmem:[%s4633_s2 + $0x78] sm:$0xff]  ;;  %v3492_v2 = vmov 0.0   ;;  %v374_v3 = vld [vmem:[%s4633_s2 + $0x70] sm:$0xff]  ;;  %v373_v5 = vld [vmem:[%s4633_s2 + $0x68] sm:$0xff]  ;;  %s354_s30 = scalar_select %p353_p10, %s3579_s0, 1  ;;  %vm3493_vm0 = vmmov 0  }
  0x17   : > { %v391_v1 = vld [vmem:[%s4633_s2 + $0xf8] sm:$0xff]  ;;  %2869 = vmatprep.subr.mxu0 %v3492_v2  ;;  %2904 = vmatprep.subr.mxu1 %v3492_v2  ;;  %v390_v4 = vld [vmem:[%s4633_s2 + $0xf0] sm:$0xff]  ;;  %v389_v6 = vld [vmem:[%s4633_s2 + $0xe8] sm:$0xff]  ;;  %vm1492_vm1 = vcmask 261120   ;;  %vm1835_vm11 = vcmask 64512   ;;  %s3436_s0 = scalar_lea.vmem %s3435_s13, 256 }
  0x18   : > { %2870 = vmatpush3.msra.mxu0 %v375_v0  ;;  %2905 = vmatpush3.msra.mxu1 %v391_v1  ;;  %v372_v7 = vld [vmem:[%s4633_s2 + $0x60] sm:$0xff]  ;;  %v371_v9 = vld [vmem:[%s4633_s2 + $0x58] sm:$0xff]  ;;  %v370_v11 = vld [vmem:[%s4633_s2 + $0x50] sm:$0xff]  ;;  %s2594_s25 = sshll.u32 %s354_s30, 3 }
  0x19   : > { %2871 = vmatprep.subr.mxu0 %v3492_v2  ;;  %2906 = vmatprep.subr.mxu1 %v3492_v2  ;;  %v388_v8 = vld [vmem:[%s4633_s2 + $0xe0] sm:$0xff]  ;;  %v387_v10 = vld [vmem:[%s4633_s2 + $0xd8] sm:$0xff]  ;;  %v386_v12 = vld [vmem:[%s4633_s2 + $0xd0] sm:$0xff]  ;;  %s356_s26 = scalar_lea.vmem %s4646_s1, %s2594_s25 }
  0x1a   : > { %2872 = vmatpush3.msra.mxu0 %v374_v3  ;;  %2907 = vmatpush3.msra.mxu1 %v390_v4  ;;  %v369_v13 = vld [vmem:[%s4633_s2 + $0x48] sm:$0xff]  ;;  %v368_v15 = vld [vmem:[%s4633_s2 + $0x40] sm:$0xff]  ;;  %v367_v17 = vld [vmem:[%s4633_s2 + $0x38] sm:$0xff] }
  0x1b   : > { %2873 = vmatprep.subr.mxu0 %v3492_v2  ;;  %2908 = vmatprep.subr.mxu1 %v3492_v2  ;;  %v385_v14 = vld [vmem:[%s4633_s2 + $0xc8] sm:$0xff]  ;;  %v384_v16 = vld [vmem:[%s4633_s2 + $0xc0] sm:$0xff]  ;;  %v383_v18 = vld [vmem:[%s4633_s2 + $0xb8] sm:$0xff] }
  0x1c   : > { %2874 = vmatpush3.msra.mxu0 %v373_v5  ;;  %2909 = vmatpush3.msra.mxu1 %v389_v6  ;;  %v366_v19 = vld [vmem:[%s4633_s2 + $0x30] sm:$0xff]  ;;  %v365_v21 = vld [vmem:[%s4633_s2 + $0x28] sm:$0xff]  ;;  %v364_v23 = vld [vmem:[%s4633_s2 + $0x20] sm:$0xff] }
  0x1d   : > { %2875 = vmatprep.subr.mxu0 %v3492_v2  ;;  %2910 = vmatprep.subr.mxu1 %v3492_v2  ;;  %v382_v20 = vld [vmem:[%s4633_s2 + $0xb0] sm:$0xff]  ;;  %v381_v22 = vld [vmem:[%s4633_s2 + $0xa8] sm:$0xff]  ;;  %v380_v24 = vld [vmem:[%s4633_s2 + $0xa0] sm:$0xff] }
  0x1e   : > { %2876 = vmatpush3.msra.mxu0 %v372_v7  ;;  %2911 = vmatpush3.msra.mxu1 %v388_v8  ;;  %v363_v25 = vld [vmem:[%s4633_s2 + $0x18] sm:$0xff]  ;;  %v362_v27 = vld [vmem:[%s4633_s2 + $0x10] sm:$0xff]  ;;  %v361_v29 = vld [vmem:[%s4633_s2 + $0x8] sm:$0xff] }
  0x1f   : > { %2877 = vmatprep.subr.mxu0 %v3492_v2  ;;  %2912 = vmatprep.subr.mxu1 %v3492_v2  ;;  %v379_v26 = vld [vmem:[%s4633_s2 + $0x98] sm:$0xff]  ;;  %v378_v28 = vld [vmem:[%s4633_s2 + $0x90] sm:$0xff]  ;;  %v377_v30 = vld [vmem:[%s4633_s2 + $0x88] sm:$0xff] }
  0x20   : > { %2878 = vmatpush3.msra.mxu0 %v371_v9  ;;  %2913 = vmatpush3.msra.mxu1 %v387_v10  ;;  %v360_v31 = vld [vmem:[%s4633_s2] sm:$0xff]  ;;  %v407_v34 = vld [vmem:[%s4633_s2 + $0x178] sm:$0xff]  ;;  %v406_v36 = vld [vmem:[%s4633_s2 + $0x170] sm:$0xff] }
  0x21   : > { %2879 = vmatprep.subr.mxu0 %v3492_v2  ;;  %2914 = vmatprep.subr.mxu1 %v3492_v2  ;;  %v376_v32 = vld [vmem:[%s4633_s2 + $0x80] sm:$0xff]  ;;  %v423_v35 = vld [vmem:[%s4633_s2 + $0x1f8] sm:$0xff]  ;;  %v422_v37 = vld [vmem:[%s4633_s2 + $0x1f0] sm:$0xff] }
  0x22   : > { %2880 = vmatpush3.msra.mxu0 %v370_v11  ;;  %2915 = vmatpush3.msra.mxu1 %v386_v12  ;;  %v3737_v33 = vld [vmem:[%s356_s26] sm:$0xff]  ;;  %v405_v38 = vld [vmem:[%s4633_s2 + $0x168] sm:$0xff]  ;;  %v403_v42 = vld [vmem:[%s4633_s2 + $0x158] sm:$0xff]  ;;  %s2593_s26 = sshll.u32 %s350_s23, 3 }
  0x23   : > { %2881 = vmatprep.subr.mxu0 %v3492_v2  ;;  %2916 = vmatprep.subr.mxu1 %v3492_v2  ;;  %v421_v39 = vld [vmem:[%s4633_s2 + $0x1e8] sm:$0xff]  ;;  %v404_v40 = vld [vmem:[%s4633_s2 + $0x160] sm:$0xff]  ;;  %v419_v43 = vld [vmem:[%s4633_s2 + $0x1d8] sm:$0xff] }
  0x24   : > { %2882 = vmatpush3.msra.mxu0 %v369_v13  ;;  %2917 = vmatpush3.msra.mxu1 %v385_v14  ;;  %v420_v41 = vld [vmem:[%s4633_s2 + $0x1e0] sm:$0xff]  ;;  %v402_v44 = vld [vmem:[%s4633_s2 + $0x150] sm:$0xff]  ;;  %v401_v46 = vld [vmem:[%s4633_s2 + $0x148] sm:$0xff] }
  0x25   : > { %2883 = vmatprep.subr.mxu0 %v3492_v2  ;;  %2918 = vmatprep.subr.mxu1 %v3492_v2  ;;  %v418_v45 = vld [vmem:[%s4633_s2 + $0x1d0] sm:$0xff]  ;;  %v417_v47 = vld [vmem:[%s4633_s2 + $0x1c8] sm:$0xff]  ;;  %v400_v48 = vld [vmem:[%s4633_s2 + $0x140] sm:$0xff] }
  0x26   : > { %2884 = vmatpush3.msra.mxu0 %v368_v15  ;;  %2919 = vmatpush3.msra.mxu1 %v384_v16  ;;  %v416_v49 = vld [vmem:[%s4633_s2 + $0x1c0] sm:$0xff]  ;;  %v399_v50 = vld [vmem:[%s4633_s2 + $0x138] sm:$0xff]  ;;  %v398_v52 = vld [vmem:[%s4633_s2 + $0x130] sm:$0xff] }
  0x27   : > { %2885 = vmatprep.subr.mxu0 %v3492_v2  ;;  %2920 = vmatprep.subr.mxu1 %v3492_v2  ;;  %v415_v51 = vld [vmem:[%s4633_s2 + $0x1b8] sm:$0xff]  ;;  %v414_v53 = vld [vmem:[%s4633_s2 + $0x1b0] sm:$0xff]  ;;  %v397_v54 = vld [vmem:[%s4633_s2 + $0x128] sm:$0xff] }
  0x28   : > { %2886 = vmatpush3.msra.mxu0 %v367_v17  ;;  %2921 = vmatpush3.msra.mxu1 %v383_v18  ;;  %v413_v55 = vld [vmem:[%s4633_s2 + $0x1a8] sm:$0xff]  ;;  %v396_v56 = vld [vmem:[%s4633_s2 + $0x120] sm:$0xff]  ;;  %v395_v58 = vld [vmem:[%s4633_s2 + $0x118] sm:$0xff] }
  0x29   : > { %2887 = vmatprep.subr.mxu0 %v3492_v2  ;;  %2922 = vmatprep.subr.mxu1 %v3492_v2  ;;  %v412_v57 = vld [vmem:[%s4633_s2 + $0x1a0] sm:$0xff]  ;;  %v411_v59 = vld [vmem:[%s4633_s2 + $0x198] sm:$0xff]  ;;  %v394_v60 = vld [vmem:[%s4633_s2 + $0x110] sm:$0xff] }
  0x2a   : > { %2888 = vmatpush3.msra.mxu0 %v366_v19  ;;  %2923 = vmatpush3.msra.mxu1 %v382_v20  ;;  %v410_v61 = vld [vmem:[%s4633_s2 + $0x190] sm:$0xff]  ;;  %v393_v62 = vld [vmem:[%s4633_s2 + $0x108] sm:$0xff]  ;;  %v392_v0 = vld [vmem:[%s4633_s2 + $0x100] sm:$0xff] }
  0x2b   : > { %2889 = vmatprep.subr.mxu0 %v3492_v2  ;;  %2924 = vmatprep.subr.mxu1 %v3492_v2  ;;  %v409_v63 = vld [vmem:[%s4633_s2 + $0x188] sm:$0xff]  ;;  %v408_v1 = vld [vmem:[%s4633_s2 + $0x180] sm:$0xff]  ;;  %v747_v3 = vld [vmem:[%s4634_s3 + $0x78] sm:$0xff] }
  0x2c   : > { %2890 = vmatpush3.msra.mxu0 %v365_v21  ;;  %2925 = vmatpush3.msra.mxu1 %v381_v22  ;;  %v763_v4 = vld [vmem:[%s4634_s3 + $0xf8] sm:$0xff]  ;;  %v746_v5 = vld [vmem:[%s4634_s3 + $0x70] sm:$0xff]  ;;  %v745_v7 = vld [vmem:[%s4634_s3 + $0x68] sm:$0xff] }
  0x2d   : > { %2891 = vmatprep.subr.mxu0 %v3492_v2  ;;  %2926 = vmatprep.subr.mxu1 %v3492_v2  ;;  %v762_v6 = vld [vmem:[%s4634_s3 + $0xf0] sm:$0xff]  ;;  %v761_v8 = vld [vmem:[%s4634_s3 + $0xe8] sm:$0xff]  ;;  %v744_v9 = vld [vmem:[%s4634_s3 + $0x60] sm:$0xff] }
  0x2e   : > { %2892 = vmatpush3.msra.mxu0 %v364_v23  ;;  %2927 = vmatpush3.msra.mxu1 %v380_v24  ;;  %v760_v10 = vld [vmem:[%s4634_s3 + $0xe0] sm:$0xff]  ;;  %v743_v11 = vld [vmem:[%s4634_s3 + $0x58] sm:$0xff]  ;;  %v742_v13 = vld [vmem:[%s4634_s3 + $0x50] sm:$0xff] }
  0x2f   : > { %2893 = vmatprep.subr.mxu0 %v3492_v2  ;;  %2928 = vmatprep.subr.mxu1 %v3492_v2  ;;  %v759_v12 = vld [vmem:[%s4634_s3 + $0xd8] sm:$0xff]  ;;  %v758_v14 = vld [vmem:[%s4634_s3 + $0xd0] sm:$0xff]  ;;  %v741_v15 = vld [vmem:[%s4634_s3 + $0x48] sm:$0xff] }
  0x30   : > { %2894 = vmatpush3.msra.mxu0 %v363_v25  ;;  %2929 = vmatpush3.msra.mxu1 %v379_v26  ;;  %v757_v16 = vld [vmem:[%s4634_s3 + $0xc8] sm:$0xff]  ;;  %v740_v17 = vld [vmem:[%s4634_s3 + $0x40] sm:$0xff]  ;;  %v739_v19 = vld [vmem:[%s4634_s3 + $0x38] sm:$0xff] }
  0x31   : > { %2895 = vmatprep.subr.mxu0 %v3492_v2  ;;  %2930 = vmatprep.subr.mxu1 %v3492_v2  ;;  %v756_v18 = vld [vmem:[%s4634_s3 + $0xc0] sm:$0xff]  ;;  %v755_v20 = vld [vmem:[%s4634_s3 + $0xb8] sm:$0xff]  ;;  %v738_v21 = vld [vmem:[%s4634_s3 + $0x30] sm:$0xff] }
  0x32   : > { %2896 = vmatpush3.msra.mxu0 %v362_v27  ;;  %2931 = vmatpush3.msra.mxu1 %v378_v28  ;;  %v754_v22 = vld [vmem:[%s4634_s3 + $0xb0] sm:$0xff]  ;;  %v737_v23 = vld [vmem:[%s4634_s3 + $0x28] sm:$0xff]  ;;  %v736_v25 = vld [vmem:[%s4634_s3 + $0x20] sm:$0xff] }
  0x33   : > { %2897 = vmatprep.subr.mxu0 %v3492_v2  ;;  %2932 = vmatprep.subr.mxu1 %v3492_v2  ;;  %v753_v24 = vld [vmem:[%s4634_s3 + $0xa8] sm:$0xff]  ;;  %v752_v26 = vld [vmem:[%s4634_s3 + $0xa0] sm:$0xff]  ;;  %v735_v27 = vld [vmem:[%s4634_s3 + $0x18] sm:$0xff] }
  0x34   : > { %2898 = vmatpush3.msra.mxu0 %v361_v29  ;;  %2933 = vmatpush3.msra.mxu1 %v377_v30  ;;  %v751_v28 = vld [vmem:[%s4634_s3 + $0x98] sm:$0xff]  ;;  %v734_v29 = vld [vmem:[%s4634_s3 + $0x10] sm:$0xff] }
  0x35   : > { %2899 = vmatprep.subr.mxu0 %v3492_v2  ;;  %2934 = vmatprep.subr.mxu1 %v3492_v2  ;;  %v750_v30 = vld [vmem:[%s4634_s3 + $0x90] sm:$0xff] }
  0x36   : > { %2900 = vmatpush3.msra.mxu0 %v360_v31  ;;  %2901 = vmatprep.mubr.msk.f32.mxu0 %vm3493_vm0, %v3492_v2  ;;  %v733_v31 = vld [vmem:[%s4634_s3 + $0x8] sm:$0xff] }
  0x37   : > { %2935 = vmatpush3.msra.mxu1 %v376_v32  ;;  %2902 = vmatmul.mubr.f32.vlgmr.msra.gmra.mxu0 %v3737_v33  ;;  %v749_v32 = vld [vmem:[%s4634_s3 + $0x88] sm:$0xff] }
  0x38   : > { %2936 = vmatprep.mubr.msk.f32.mxu1 %vm3493_vm0, %v3492_v2  ;;  %2939 = vmatprep.subr.mxu0 %v3492_v2 }
  0x39   : > { %2974 = vmatprep.subr.mxu1 %v3492_v2  ;;  %2937 = vmatmul.mubr.f32.vlgmr.msra.gmra.mxu1 %v3737_v33 }
  0x3a   : > { %2940 = vmatpush3.msra.mxu0 %v407_v34  ;;  %2975 = vmatpush3.msra.mxu1 %v423_v35  ;;  %v732_v34 = vld [vmem:[%s4634_s3] sm:$0xff] }
  0x3b   : > { %2941 = vmatprep.subr.mxu0 %v3492_v2  ;;  %2976 = vmatprep.subr.mxu1 %v3492_v2  ;;  %v748_v35 = vld [vmem:[%s4634_s3 + $0x80] sm:$0xff] }
  0x3c   : > { %2942 = vmatpush3.msra.mxu0 %v406_v36  ;;  %2977 = vmatpush3.msra.mxu1 %v422_v37  ;;  %v779_v36 = vld [vmem:[%s4634_s3 + $0x178] sm:$0xff] }
  0x3d   : > { %2943 = vmatprep.subr.mxu0 %v3492_v2  ;;  %2978 = vmatprep.subr.mxu1 %v3492_v2  ;;  %v795_v37 = vld [vmem:[%s4634_s3 + $0x1f8] sm:$0xff] }
  0x3e   : > { %2944 = vmatpush3.msra.mxu0 %v405_v38  ;;  %2979 = vmatpush3.msra.mxu1 %v421_v39  ;;  %v778_v38 = vld [vmem:[%s4634_s3 + $0x170] sm:$0xff] }
  0x3f   : > { %2945 = vmatprep.subr.mxu0 %v3492_v2  ;;  %2980 = vmatprep.subr.mxu1 %v3492_v2  ;;  %v794_v39 = vld [vmem:[%s4634_s3 + $0x1f0] sm:$0xff] }
  0x40   : > { %2946 = vmatpush3.msra.mxu0 %v404_v40  ;;  %2981 = vmatpush3.msra.mxu1 %v420_v41  ;;  %v777_v40 = vld [vmem:[%s4634_s3 + $0x168] sm:$0xff] }
  0x41   : > { %2947 = vmatprep.subr.mxu0 %v3492_v2  ;;  %2982 = vmatprep.subr.mxu1 %v3492_v2  ;;  %v793_v41 = vld [vmem:[%s4634_s3 + $0x1e8] sm:$0xff] }
  0x42   : > { %2948 = vmatpush3.msra.mxu0 %v403_v42  ;;  %2983 = vmatpush3.msra.mxu1 %v419_v43  ;;  %v776_v42 = vld [vmem:[%s4634_s3 + $0x160] sm:$0xff] }
  0x43   : > { %2949 = vmatprep.subr.mxu0 %v3492_v2  ;;  %2984 = vmatprep.subr.mxu1 %v3492_v2  ;;  %v792_v43 = vld [vmem:[%s4634_s3 + $0x1e0] sm:$0xff] }
  0x44   : > { %2950 = vmatpush3.msra.mxu0 %v402_v44  ;;  %2985 = vmatpush3.msra.mxu1 %v418_v45  ;;  %v775_v44 = vld [vmem:[%s4634_s3 + $0x158] sm:$0xff] }
  0x45   : > { %2951 = vmatprep.subr.mxu0 %v3492_v2  ;;  %2986 = vmatprep.subr.mxu1 %v3492_v2  ;;  %v791_v45 = vld [vmem:[%s4634_s3 + $0x1d8] sm:$0xff] }
  0x46   : > { %2952 = vmatpush3.msra.mxu0 %v401_v46  ;;  %2987 = vmatpush3.msra.mxu1 %v417_v47  ;;  %v774_v46 = vld [vmem:[%s4634_s3 + $0x150] sm:$0xff] }
  0x47   : > { %2953 = vmatprep.subr.mxu0 %v3492_v2  ;;  %2988 = vmatprep.subr.mxu1 %v3492_v2  ;;  %v790_v47 = vld [vmem:[%s4634_s3 + $0x1d0] sm:$0xff] }
  0x48   : > { %2954 = vmatpush3.msra.mxu0 %v400_v48  ;;  %2989 = vmatpush3.msra.mxu1 %v416_v49  ;;  %v773_v48 = vld [vmem:[%s4634_s3 + $0x148] sm:$0xff] }
  0x49   : > { %2955 = vmatprep.subr.mxu0 %v3492_v2  ;;  %2990 = vmatprep.subr.mxu1 %v3492_v2  ;;  %v789_v49 = vld [vmem:[%s4634_s3 + $0x1c8] sm:$0xff] }
  0x4a   : > { %2956 = vmatpush3.msra.mxu0 %v399_v50  ;;  %2991 = vmatpush3.msra.mxu1 %v415_v51  ;;  %v772_v50 = vld [vmem:[%s4634_s3 + $0x140] sm:$0xff] }
  0x4b   : > { %2957 = vmatprep.subr.mxu0 %v3492_v2  ;;  %2992 = vmatprep.subr.mxu1 %v3492_v2  ;;  %v788_v51 = vld [vmem:[%s4634_s3 + $0x1c0] sm:$0xff] }
  0x4c   : > { %2958 = vmatpush3.msra.mxu0 %v398_v52  ;;  %2993 = vmatpush3.msra.mxu1 %v414_v53  ;;  %v771_v52 = vld [vmem:[%s4634_s3 + $0x138] sm:$0xff] }
  0x4d   : > { %2959 = vmatprep.subr.mxu0 %v3492_v2  ;;  %2994 = vmatprep.subr.mxu1 %v3492_v2  ;;  %v787_v53 = vld [vmem:[%s4634_s3 + $0x1b8] sm:$0xff] }
  0x4e   : > { %2960 = vmatpush3.msra.mxu0 %v397_v54  ;;  %2995 = vmatpush3.msra.mxu1 %v413_v55  ;;  %v770_v54 = vld [vmem:[%s4634_s3 + $0x130] sm:$0xff] }
  0x4f   : > { %2961 = vmatprep.subr.mxu0 %v3492_v2  ;;  %2996 = vmatprep.subr.mxu1 %v3492_v2  ;;  %v786_v55 = vld [vmem:[%s4634_s3 + $0x1b0] sm:$0xff] }
  0x50   : > { %2962 = vmatpush3.msra.mxu0 %v396_v56  ;;  %2997 = vmatpush3.msra.mxu1 %v412_v57  ;;  %v769_v56 = vld [vmem:[%s4634_s3 + $0x128] sm:$0xff] }
  0x51   : > { %2963 = vmatprep.subr.mxu0 %v3492_v2  ;;  %2998 = vmatprep.subr.mxu1 %v3492_v2  ;;  %v785_v57 = vld [vmem:[%s4634_s3 + $0x1a8] sm:$0xff] }
  0x52   : > { %2964 = vmatpush3.msra.mxu0 %v395_v58  ;;  %2999 = vmatpush3.msra.mxu1 %v411_v59  ;;  %v768_v58 = vld [vmem:[%s4634_s3 + $0x120] sm:$0xff] }
  0x53   : > { %2965 = vmatprep.subr.mxu0 %v3492_v2  ;;  %3000 = vmatprep.subr.mxu1 %v3492_v2  ;;  %v784_v59 = vld [vmem:[%s4634_s3 + $0x1a0] sm:$0xff] }
  0x54   : > { %2966 = vmatpush3.msra.mxu0 %v394_v60  ;;  %3001 = vmatpush3.msra.mxu1 %v410_v61  ;;  %v767_v60 = vld [vmem:[%s4634_s3 + $0x118] sm:$0xff] }
  0x55   : > { %2967 = vmatprep.subr.mxu0 %v3492_v2  ;;  %3002 = vmatprep.subr.mxu1 %v3492_v2  ;;  %v783_v61 = vld [vmem:[%s4634_s3 + $0x198] sm:$0xff] }
  0x56   : > { %2968 = vmatpush3.msra.mxu0 %v393_v62  ;;  %3003 = vmatpush3.msra.mxu1 %v409_v63  ;;  %v766_v62 = vld [vmem:[%s4634_s3 + $0x110] sm:$0xff] }
  0x57   : > { %2969 = vmatprep.subr.mxu0 %v3492_v2  ;;  %3004 = vmatprep.subr.mxu1 %v3492_v2  ;;  %v782_v63 = vld [vmem:[%s4634_s3 + $0x190] sm:$0xff] }
  0x58   : > { %2970 = vmatpush3.msra.mxu0 %v392_v0  ;;  %2971 = vmatprep.mubr.msk.f32.mxu0 %vm3493_vm0, %v3492_v2  ;;  %v765_v0 = vld [vmem:[%s4634_s3 + $0x108] sm:$0xff] }
  0x59   : > { %3005 = vmatpush3.msra.mxu1 %v408_v1  ;;  %2972 = vmatmul.mubr.f32.vlgmr.msra.gmra.mxu0 %v3737_v33  ;;  %v781_v1 = vld [vmem:[%s4634_s3 + $0x188] sm:$0xff] }
  0x5a   : > { %3006 = vmatprep.mubr.msk.f32.mxu1 %vm3493_vm0, %v3492_v2  ;;  %3009 = vmatprep.subr.mxu0 %v3492_v2 }
  0x5b   : > { %3044 = vmatprep.subr.mxu1 %v3492_v2  ;;  %3007 = vmatmul.mubr.f32.vlgmr.msra.gmra.mxu1 %v3737_v33 }
  0x5c   : > { %3010 = vmatpush3.msra.mxu0 %v747_v3  ;;  %3045 = vmatpush3.msra.mxu1 %v763_v4  ;;  %v764_v3 = vld [vmem:[%s4634_s3 + $0x100] sm:$0xff] }
  0x5d   : > { %3011 = vmatprep.subr.mxu0 %v3492_v2  ;;  %3046 = vmatprep.subr.mxu1 %v3492_v2  ;;  %v780_v4 = vld [vmem:[%s4634_s3 + $0x180] sm:$0xff] }
  0x5e   : > { %3012 = vmatpush3.msra.mxu0 %v746_v5  ;;  %3047 = vmatpush3.msra.mxu1 %v762_v6  ;;  %v1119_v5 = vld [vmem:[%s4635_s4 + $0x78] sm:$0xff] }
  0x5f   : > { %3013 = vmatprep.subr.mxu0 %v3492_v2  ;;  %3048 = vmatprep.subr.mxu1 %v3492_v2  ;;  %v1135_v6 = vld [vmem:[%s4635_s4 + $0xf8] sm:$0xff] }
  0x60   : > { %3014 = vmatpush3.msra.mxu0 %v745_v7  ;;  %3049 = vmatpush3.msra.mxu1 %v761_v8  ;;  %v1118_v7 = vld [vmem:[%s4635_s4 + $0x70] sm:$0xff] }
  0x61   : > { %3015 = vmatprep.subr.mxu0 %v3492_v2  ;;  %3050 = vmatprep.subr.mxu1 %v3492_v2  ;;  %v1134_v8 = vld [vmem:[%s4635_s4 + $0xf0] sm:$0xff] }
  0x62   : > { %3016 = vmatpush3.msra.mxu0 %v744_v9  ;;  %3051 = vmatpush3.msra.mxu1 %v760_v10  ;;  %v1117_v9 = vld [vmem:[%s4635_s4 + $0x68] sm:$0xff] }
  0x63   : > { %3017 = vmatprep.subr.mxu0 %v3492_v2  ;;  %3052 = vmatprep.subr.mxu1 %v3492_v2  ;;  %v1133_v10 = vld [vmem:[%s4635_s4 + $0xe8] sm:$0xff] }
  0x64   : > { %3018 = vmatpush3.msra.mxu0 %v743_v11  ;;  %3053 = vmatpush3.msra.mxu1 %v759_v12  ;;  %v1116_v11 = vld [vmem:[%s4635_s4 + $0x60] sm:$0xff] }
  0x65   : > { %3019 = vmatprep.subr.mxu0 %v3492_v2  ;;  %3054 = vmatprep.subr.mxu1 %v3492_v2  ;;  %v1132_v12 = vld [vmem:[%s4635_s4 + $0xe0] sm:$0xff] }
  0x66   : > { %3020 = vmatpush3.msra.mxu0 %v742_v13  ;;  %3055 = vmatpush3.msra.mxu1 %v758_v14  ;;  %v1115_v13 = vld [vmem:[%s4635_s4 + $0x58] sm:$0xff] }
  0x67   : > { %3021 = vmatprep.subr.mxu0 %v3492_v2  ;;  %3056 = vmatprep.subr.mxu1 %v3492_v2  ;;  %v1131_v14 = vld [vmem:[%s4635_s4 + $0xd8] sm:$0xff] }
  0x68   : > { %3022 = vmatpush3.msra.mxu0 %v741_v15  ;;  %3057 = vmatpush3.msra.mxu1 %v757_v16  ;;  %v1114_v15 = vld [vmem:[%s4635_s4 + $0x50] sm:$0xff] }
  0x69   : > { %3023 = vmatprep.subr.mxu0 %v3492_v2  ;;  %3058 = vmatprep.subr.mxu1 %v3492_v2  ;;  %v1130_v16 = vld [vmem:[%s4635_s4 + $0xd0] sm:$0xff] }
  0x6a   : > { %3024 = vmatpush3.msra.mxu0 %v740_v17  ;;  %3059 = vmatpush3.msra.mxu1 %v756_v18  ;;  %v1113_v17 = vld [vmem:[%s4635_s4 + $0x48] sm:$0xff] }
  0x6b   : > { %3025 = vmatprep.subr.mxu0 %v3492_v2  ;;  %3060 = vmatprep.subr.mxu1 %v3492_v2  ;;  %v1129_v18 = vld [vmem:[%s4635_s4 + $0xc8] sm:$0xff] }
  0x6c   : > { %3026 = vmatpush3.msra.mxu0 %v739_v19  ;;  %3061 = vmatpush3.msra.mxu1 %v755_v20  ;;  %v1112_v19 = vld [vmem:[%s4635_s4 + $0x40] sm:$0xff] }
  0x6d   : > { %3027 = vmatprep.subr.mxu0 %v3492_v2  ;;  %3062 = vmatprep.subr.mxu1 %v3492_v2  ;;  %v1128_v20 = vld [vmem:[%s4635_s4 + $0xc0] sm:$0xff] }
  0x6e   : > { %3028 = vmatpush3.msra.mxu0 %v738_v21  ;;  %3063 = vmatpush3.msra.mxu1 %v754_v22  ;;  %v1111_v21 = vld [vmem:[%s4635_s4 + $0x38] sm:$0xff] }
  0x6f   : > { %3029 = vmatprep.subr.mxu0 %v3492_v2  ;;  %3064 = vmatprep.subr.mxu1 %v3492_v2  ;;  %v1127_v22 = vld [vmem:[%s4635_s4 + $0xb8] sm:$0xff] }
  0x70   : > { %3030 = vmatpush3.msra.mxu0 %v737_v23  ;;  %3065 = vmatpush3.msra.mxu1 %v753_v24  ;;  %v1110_v23 = vld [vmem:[%s4635_s4 + $0x30] sm:$0xff] }
  0x71   : > { %3031 = vmatprep.subr.mxu0 %v3492_v2  ;;  %3066 = vmatprep.subr.mxu1 %v3492_v2  ;;  %v1126_v24 = vld [vmem:[%s4635_s4 + $0xb0] sm:$0xff] }
  0x72   : > { %3032 = vmatpush3.msra.mxu0 %v736_v25  ;;  %3067 = vmatpush3.msra.mxu1 %v752_v26  ;;  %v1109_v25 = vld [vmem:[%s4635_s4 + $0x28] sm:$0xff] }
  0x73   : > { %3033 = vmatprep.subr.mxu0 %v3492_v2  ;;  %3068 = vmatprep.subr.mxu1 %v3492_v2  ;;  %v1125_v26 = vld [vmem:[%s4635_s4 + $0xa8] sm:$0xff] }
  0x74   : > { %3034 = vmatpush3.msra.mxu0 %v735_v27  ;;  %3069 = vmatpush3.msra.mxu1 %v751_v28  ;;  %v1108_v27 = vld [vmem:[%s4635_s4 + $0x20] sm:$0xff] }
  0x75   : > { %3035 = vmatprep.subr.mxu0 %v3492_v2  ;;  %3070 = vmatprep.subr.mxu1 %v3492_v2  ;;  %v1124_v28 = vld [vmem:[%s4635_s4 + $0xa0] sm:$0xff] }
  0x76   : > { %3036 = vmatpush3.msra.mxu0 %v734_v29  ;;  %3071 = vmatpush3.msra.mxu1 %v750_v30  ;;  %v1107_v29 = vld [vmem:[%s4635_s4 + $0x18] sm:$0xff] }
  0x77   : > { %3037 = vmatprep.subr.mxu0 %v3492_v2  ;;  %3072 = vmatprep.subr.mxu1 %v3492_v2  ;;  %v1123_v30 = vld [vmem:[%s4635_s4 + $0x98] sm:$0xff] }
  0x78   : > { %3038 = vmatpush3.msra.mxu0 %v733_v31  ;;  %3073 = vmatpush3.msra.mxu1 %v749_v32  ;;  %v1106_v31 = vld [vmem:[%s4635_s4 + $0x10] sm:$0xff] }
  0x79   : > { %3039 = vmatprep.subr.mxu0 %v3492_v2  ;;  %3074 = vmatprep.subr.mxu1 %v3492_v2  ;;  %v1122_v32 = vld [vmem:[%s4635_s4 + $0x90] sm:$0xff] }
  0x7a   : > { %3040 = vmatpush3.msra.mxu0 %v732_v34  ;;  %3041 = vmatprep.mubr.msk.f32.mxu0 %vm3493_vm0, %v3492_v2  ;;  %v1105_v34 = vld [vmem:[%s4635_s4 + $0x8] sm:$0xff] }
  0x7b   : > { %3075 = vmatpush3.msra.mxu1 %v748_v35  ;;  %3076 = vmatprep.mubr.msk.f32.mxu1 %vm3493_vm0, %v3492_v2  ;;  %v1121_v35 = vld [vmem:[%s4635_s4 + $0x88] sm:$0xff] }
  0x7c   : > { %3042 = vmatmul.mubr.f32.vlgmr.msra.gmra.mxu0 %v3737_v33  ;;  %3077 = vmatmul.mubr.f32.vlgmr.msra.gmra.mxu1 %v3737_v33 }
  0x7d   : > { %3079 = vmatprep.subr.mxu0 %v3492_v2  ;;  %3114 = vmatprep.subr.mxu1 %v3492_v2 }
  0x7e   : > { %3080 = vmatpush3.msra.mxu0 %v779_v36  ;;  %3115 = vmatpush3.msra.mxu1 %v795_v37  ;;  %v1104_v36 = vld [vmem:[%s4635_s4] sm:$0xff] }
  0x7f   : > { %3081 = vmatprep.subr.mxu0 %v3492_v2  ;;  %3116 = vmatprep.subr.mxu1 %v3492_v2  ;;  %v1120_v37 = vld [vmem:[%s4635_s4 + $0x80] sm:$0xff] }
  0x80   : > { %3082 = vmatpush3.msra.mxu0 %v778_v38  ;;  %3117 = vmatpush3.msra.mxu1 %v794_v39  ;;  %v1151_v38 = vld [vmem:[%s4635_s4 + $0x178] sm:$0xff] }
  0x81   : > { %3083 = vmatprep.subr.mxu0 %v3492_v2  ;;  %3118 = vmatprep.subr.mxu1 %v3492_v2  ;;  %v1167_v39 = vld [vmem:[%s4635_s4 + $0x1f8] sm:$0xff] }
  0x82   : > { %3084 = vmatpush3.msra.mxu0 %v777_v40  ;;  %3119 = vmatpush3.msra.mxu1 %v793_v41  ;;  %v1150_v40 = vld [vmem:[%s4635_s4 + $0x170] sm:$0xff] }
  0x83   : > { %3085 = vmatprep.subr.mxu0 %v3492_v2  ;;  %3120 = vmatprep.subr.mxu1 %v3492_v2  ;;  %v1166_v41 = vld [vmem:[%s4635_s4 + $0x1f0] sm:$0xff] }
  0x84   : > { %3086 = vmatpush3.msra.mxu0 %v776_v42  ;;  %3121 = vmatpush3.msra.mxu1 %v792_v43  ;;  %v1149_v42 = vld [vmem:[%s4635_s4 + $0x168] sm:$0xff] }
  0x85   : > { %3087 = vmatprep.subr.mxu0 %v3492_v2  ;;  %3122 = vmatprep.subr.mxu1 %v3492_v2  ;;  %v1165_v43 = vld [vmem:[%s4635_s4 + $0x1e8] sm:$0xff] }
  0x86   : > { %3088 = vmatpush3.msra.mxu0 %v775_v44  ;;  %3123 = vmatpush3.msra.mxu1 %v791_v45  ;;  %v1148_v44 = vld [vmem:[%s4635_s4 + $0x160] sm:$0xff] }
  0x87   : > { %3089 = vmatprep.subr.mxu0 %v3492_v2  ;;  %3124 = vmatprep.subr.mxu1 %v3492_v2  ;;  %v1164_v45 = vld [vmem:[%s4635_s4 + $0x1e0] sm:$0xff] }
  0x88   : > { %3090 = vmatpush3.msra.mxu0 %v774_v46  ;;  %3125 = vmatpush3.msra.mxu1 %v790_v47  ;;  %v1147_v46 = vld [vmem:[%s4635_s4 + $0x158] sm:$0xff] }
  0x89   : > { %3091 = vmatprep.subr.mxu0 %v3492_v2  ;;  %3126 = vmatprep.subr.mxu1 %v3492_v2  ;;  %v1163_v47 = vld [vmem:[%s4635_s4 + $0x1d8] sm:$0xff] }
  0x8a   : > { %3092 = vmatpush3.msra.mxu0 %v773_v48  ;;  %3127 = vmatpush3.msra.mxu1 %v789_v49  ;;  %v1146_v48 = vld [vmem:[%s4635_s4 + $0x150] sm:$0xff] }
  0x8b   : > { %3093 = vmatprep.subr.mxu0 %v3492_v2  ;;  %3128 = vmatprep.subr.mxu1 %v3492_v2  ;;  %v1162_v49 = vld [vmem:[%s4635_s4 + $0x1d0] sm:$0xff] }
  0x8c   : > { %3094 = vmatpush3.msra.mxu0 %v772_v50  ;;  %3129 = vmatpush3.msra.mxu1 %v788_v51  ;;  %v1145_v50 = vld [vmem:[%s4635_s4 + $0x148] sm:$0xff] }
  0x8d   : > { %3095 = vmatprep.subr.mxu0 %v3492_v2  ;;  %3130 = vmatprep.subr.mxu1 %v3492_v2  ;;  %v1161_v51 = vld [vmem:[%s4635_s4 + $0x1c8] sm:$0xff] }
  0x8e   : > { %3096 = vmatpush3.msra.mxu0 %v771_v52  ;;  %3131 = vmatpush3.msra.mxu1 %v787_v53  ;;  %v1144_v52 = vld [vmem:[%s4635_s4 + $0x140] sm:$0xff] }
  0x8f   : > { %3097 = vmatprep.subr.mxu0 %v3492_v2  ;;  %3132 = vmatprep.subr.mxu1 %v3492_v2  ;;  %v1160_v53 = vld [vmem:[%s4635_s4 + $0x1c0] sm:$0xff] }
  0x90   : > { %3098 = vmatpush3.msra.mxu0 %v770_v54  ;;  %3133 = vmatpush3.msra.mxu1 %v786_v55  ;;  %v1143_v54 = vld [vmem:[%s4635_s4 + $0x138] sm:$0xff] }
  0x91   : > { %3099 = vmatprep.subr.mxu0 %v3492_v2  ;;  %3134 = vmatprep.subr.mxu1 %v3492_v2  ;;  %v1159_v55 = vld [vmem:[%s4635_s4 + $0x1b8] sm:$0xff] }
  0x92   : > { %3100 = vmatpush3.msra.mxu0 %v769_v56  ;;  %3135 = vmatpush3.msra.mxu1 %v785_v57  ;;  %v1142_v56 = vld [vmem:[%s4635_s4 + $0x130] sm:$0xff] }
  0x93   : > { %3101 = vmatprep.subr.mxu0 %v3492_v2  ;;  %3136 = vmatprep.subr.mxu1 %v3492_v2  ;;  %v1158_v57 = vld [vmem:[%s4635_s4 + $0x1b0] sm:$0xff] }
  0x94   : > { %3102 = vmatpush3.msra.mxu0 %v768_v58  ;;  %3137 = vmatpush3.msra.mxu1 %v784_v59  ;;  %v1141_v58 = vld [vmem:[%s4635_s4 + $0x128] sm:$0xff] }
  0x95   : > { %3103 = vmatprep.subr.mxu0 %v3492_v2  ;;  %3138 = vmatprep.subr.mxu1 %v3492_v2  ;;  %v1157_v59 = vld [vmem:[%s4635_s4 + $0x1a8] sm:$0xff] }
  0x96   : > { %3104 = vmatpush3.msra.mxu0 %v767_v60  ;;  %3139 = vmatpush3.msra.mxu1 %v783_v61  ;;  %v1140_v60 = vld [vmem:[%s4635_s4 + $0x120] sm:$0xff] }
  0x97   : > { %3105 = vmatprep.subr.mxu0 %v3492_v2  ;;  %3140 = vmatprep.subr.mxu1 %v3492_v2  ;;  %v1156_v61 = vld [vmem:[%s4635_s4 + $0x1a0] sm:$0xff] }
  0x98   : > { %3106 = vmatpush3.msra.mxu0 %v766_v62  ;;  %3141 = vmatpush3.msra.mxu1 %v782_v63  ;;  %v1139_v62 = vld [vmem:[%s4635_s4 + $0x118] sm:$0xff] }
  0x99   : > { %3107 = vmatprep.subr.mxu0 %v3492_v2  ;;  %3142 = vmatprep.subr.mxu1 %v3492_v2  ;;  %v1155_v63 = vld [vmem:[%s4635_s4 + $0x198] sm:$0xff] }
  0x9a   : > { %3108 = vmatpush3.msra.mxu0 %v765_v0  ;;  %3143 = vmatpush3.msra.mxu1 %v781_v1  ;;  %v1138_v0 = vld [vmem:[%s4635_s4 + $0x110] sm:$0xff] }
  0x9b   : > { %3109 = vmatprep.subr.mxu0 %v3492_v2  ;;  %3144 = vmatprep.subr.mxu1 %v3492_v2  ;;  %v1154_v1 = vld [vmem:[%s4635_s4 + $0x190] sm:$0xff] }
  0x9c   : > { %3110 = vmatpush3.msra.mxu0 %v764_v3  ;;  %3111 = vmatprep.mubr.msk.f32.mxu0 %vm3493_vm0, %v3492_v2  ;;  %v1137_v3 = vld [vmem:[%s4635_s4 + $0x108] sm:$0xff] }
  0x9d   : > { %3145 = vmatpush3.msra.mxu1 %v780_v4  ;;  %3146 = vmatprep.mubr.msk.f32.mxu1 %vm3493_vm0, %v3492_v2  ;;  %v1153_v4 = vld [vmem:[%s4635_s4 + $0x188] sm:$0xff] }
  0x9e   : > { %3112 = vmatmul.mubr.f32.vlgmr.msra.gmra.mxu0 %v3737_v33  ;;  %3147 = vmatmul.mubr.f32.vlgmr.msra.gmra.mxu1 %v3737_v33 }
  0x9f   : > { %3149 = vmatprep.subr.mxu0 %v3492_v2  ;;  %3184 = vmatprep.subr.mxu1 %v3492_v2 }
  0xa0   : > { %3150 = vmatpush3.msra.mxu0 %v1119_v5  ;;  %3185 = vmatpush3.msra.mxu1 %v1135_v6  ;;  %v1136_v5 = vld [vmem:[%s4635_s4 + $0x100] sm:$0xff] }
  0xa1   : > { %3151 = vmatprep.subr.mxu0 %v3492_v2  ;;  %3186 = vmatprep.subr.mxu1 %v3492_v2  ;;  %v1152_v6 = vld [vmem:[%s4635_s4 + $0x180] sm:$0xff] }
  0xa2   : > { %3152 = vmatpush3.msra.mxu0 %v1118_v7  ;;  %3187 = vmatpush3.msra.mxu1 %v1134_v8 }
  0xa3   : > { %3153 = vmatprep.subr.mxu0 %v3492_v2  ;;  %3188 = vmatprep.subr.mxu1 %v3492_v2 }
  0xa4   : > { %3154 = vmatpush3.msra.mxu0 %v1117_v9  ;;  %3189 = vmatpush3.msra.mxu1 %v1133_v10 }
  0xa5   : > { %3155 = vmatprep.subr.mxu0 %v3492_v2  ;;  %3190 = vmatprep.subr.mxu1 %v3492_v2 }
  0xa6   : > { %3156 = vmatpush3.msra.mxu0 %v1116_v11  ;;  %3191 = vmatpush3.msra.mxu1 %v1132_v12 }
  0xa7   : > { %3157 = vmatprep.subr.mxu0 %v3492_v2  ;;  %3192 = vmatprep.subr.mxu1 %v3492_v2 }
  0xa8   : > { %3158 = vmatpush3.msra.mxu0 %v1115_v13  ;;  %3193 = vmatpush3.msra.mxu1 %v1131_v14 }
  0xa9   : > { %3159 = vmatprep.subr.mxu0 %v3492_v2  ;;  %3194 = vmatprep.subr.mxu1 %v3492_v2 }
  0xaa   : > { %3160 = vmatpush3.msra.mxu0 %v1114_v15  ;;  %3195 = vmatpush3.msra.mxu1 %v1130_v16  ;;  %v2600_v15 = vld [vmem:[%s4638_s7 + $0x1] ss:$0 sm:$0xff] }
  0xab   : > { %3161 = vmatprep.subr.mxu0 %v3492_v2  ;;  %3196 = vmatprep.subr.mxu1 %v3492_v2 }
  0xac   : > { %3162 = vmatpush3.msra.mxu0 %v1113_v17  ;;  %3197 = vmatpush3.msra.mxu1 %v1129_v18 }
  0xad   : > { %3163 = vmatprep.subr.mxu0 %v3492_v2  ;;  %3198 = vmatprep.subr.mxu1 %v3492_v2 }
  0xae   : > { %3164 = vmatpush3.msra.mxu0 %v1112_v19  ;;  %3199 = vmatpush3.msra.mxu1 %v1128_v20 }
  0xaf   : > { %3165 = vmatprep.subr.mxu0 %v3492_v2  ;;  %3200 = vmatprep.subr.mxu1 %v3492_v2 }
  0xb0   : > { %3166 = vmatpush3.msra.mxu0 %v1111_v21  ;;  %3201 = vmatpush3.msra.mxu1 %v1127_v22 }
  0xb1   : > { %3167 = vmatprep.subr.mxu0 %v3492_v2  ;;  %3202 = vmatprep.subr.mxu1 %v3492_v2 }
  0xb2   : > { %3168 = vmatpush3.msra.mxu0 %v1110_v23  ;;  %3203 = vmatpush3.msra.mxu1 %v1126_v24  ;;  %v2595_v24 = vld [vmem:[%s4637_s6] ss:$0 sm:$0xff] }
  0xb3   : > { %3169 = vmatprep.subr.mxu0 %v3492_v2  ;;  %3204 = vmatprep.subr.mxu1 %v3492_v2 }
  0xb4   : > { %3170 = vmatpush3.msra.mxu0 %v1109_v25  ;;  %3205 = vmatpush3.msra.mxu1 %v1125_v26  ;;  %v2596_v25 = vld [vmem:[%s4637_s6 + $0x1] ss:$0 sm:$0xff] }
  0xb5   : > { %3171 = vmatprep.subr.mxu0 %v3492_v2  ;;  %3206 = vmatprep.subr.mxu1 %v3492_v2 }
  0xb6   : > { %3172 = vmatpush3.msra.mxu0 %v1108_v27  ;;  %3207 = vmatpush3.msra.mxu1 %v1124_v28 }
  0xb7   : > { %3173 = vmatprep.subr.mxu0 %v3492_v2  ;;  %3208 = vmatprep.subr.mxu1 %v3492_v2 }
  0xb8   : > { %3174 = vmatpush3.msra.mxu0 %v1107_v29  ;;  %3209 = vmatpush3.msra.mxu1 %v1123_v30  ;;  %v2601_v30 = vld [vmem:[%s4638_s7 + $0x2] ss:$0 sm:$0xff] }
  0xb9   : > { %3175 = vmatprep.subr.mxu0 %v3492_v2  ;;  %3210 = vmatprep.subr.mxu1 %v3492_v2 }
  0xba   : > { %3176 = vmatpush3.msra.mxu0 %v1106_v31  ;;  %3211 = vmatpush3.msra.mxu1 %v1122_v32  ;;  %v2602_v31 = vld [vmem:[%s4638_s7 + $0x3] ss:$0 sm:$0xff] }
  0xbb   : > { %3177 = vmatprep.subr.mxu0 %v3492_v2  ;;  %3212 = vmatprep.subr.mxu1 %v3492_v2 }
  0xbc   : > { %3178 = vmatpush3.msra.mxu0 %v1105_v34  ;;  %3213 = vmatpush3.msra.mxu1 %v1121_v35 }
  0xbd   : > { %3179 = vmatprep.subr.mxu0 %v3492_v2  ;;  %3214 = vmatprep.subr.mxu1 %v3492_v2 }
  0xbe   : > { %3180 = vmatpush3.msra.mxu0 %v1104_v36  ;;  %3215 = vmatpush3.msra.mxu1 %v1120_v37 }
  0xbf   : > { %3181 = vmatprep.mubr.msk.f32.mxu0 %vm3493_vm0, %v3492_v2  ;;  %3216 = vmatprep.mubr.msk.f32.mxu1 %vm3493_vm0, %v3492_v2 }
  0xc0   : > { %3219 = vmatprep.subr.mxu0 %v3492_v2  ;;  %3254 = vmatprep.subr.mxu1 %v3492_v2 }
  0xc1   : > { %3182 = vmatmul.mubr.f32.vlgmr.msra.gmra.mxu0 %v3737_v33  ;;  %3217 = vmatmul.mubr.f32.vlgmr.msra.gmra.mxu1 %v3737_v33 }
  0xc2   : > { %3220 = vmatpush3.msra.mxu0 %v1151_v38  ;;  %3255 = vmatpush3.msra.mxu1 %v1167_v39 }
  0xc3   : > { %3221 = vmatprep.subr.mxu0 %v3492_v2  ;;  %3256 = vmatprep.subr.mxu1 %v3492_v2 }
  0xc4   : > { %3222 = vmatpush3.msra.mxu0 %v1150_v40  ;;  %3257 = vmatpush3.msra.mxu1 %v1166_v41  ;;  %v2597_v41 = vld [vmem:[%s4637_s6 + $0x2] ss:$0 sm:$0xff] }
  0xc5   : > { %3223 = vmatprep.subr.mxu0 %v3492_v2  ;;  %3258 = vmatprep.subr.mxu1 %v3492_v2 }
  0xc6   : > { %3224 = vmatpush3.msra.mxu0 %v1149_v42  ;;  %3259 = vmatpush3.msra.mxu1 %v1165_v43  ;;  %v2598_v42 = vld [vmem:[%s4637_s6 + $0x3] ss:$0 sm:$0xff] }
  0xc7   : > { %3225 = vmatprep.subr.mxu0 %v3492_v2  ;;  %3260 = vmatprep.subr.mxu1 %v3492_v2 }
  0xc8   : > { %3226 = vmatpush3.msra.mxu0 %v1148_v44  ;;  %3261 = vmatpush3.msra.mxu1 %v1164_v45 }
  0xc9   : > { %3227 = vmatprep.subr.mxu0 %v3492_v2  ;;  %3262 = vmatprep.subr.mxu1 %v3492_v2 }
  0xca   : > { %3228 = vmatpush3.msra.mxu0 %v1147_v46  ;;  %3263 = vmatpush3.msra.mxu1 %v1163_v47  ;;  %v2603_v47 = vld [vmem:[%s4639_s8] ss:$0 sm:$0xff] }
  0xcb   : > { %3229 = vmatprep.subr.mxu0 %v3492_v2  ;;  %3264 = vmatprep.subr.mxu1 %v3492_v2 }
  0xcc   : > { %3230 = vmatpush3.msra.mxu0 %v1146_v48  ;;  %3265 = vmatpush3.msra.mxu1 %v1162_v49  ;;  %v2604_v48 = vld [vmem:[%s4639_s8 + $0x1] ss:$0 sm:$0xff] }
  0xcd   : > { %3231 = vmatprep.subr.mxu0 %v3492_v2  ;;  %3266 = vmatprep.subr.mxu1 %v3492_v2 }
  0xce   : > { %3232 = vmatpush3.msra.mxu0 %v1145_v50  ;;  %3267 = vmatpush3.msra.mxu1 %v1161_v51 }
  0xcf   : > { %3233 = vmatprep.subr.mxu0 %v3492_v2  ;;  %3268 = vmatprep.subr.mxu1 %v3492_v2 }
  0xd0   : > { %3234 = vmatpush3.msra.mxu0 %v1144_v52  ;;  %3269 = vmatpush3.msra.mxu1 %v1160_v53 }
  0xd1   : > { %3235 = vmatprep.subr.mxu0 %v3492_v2  ;;  %3270 = vmatprep.subr.mxu1 %v3492_v2 }
  0xd2   : > { %3236 = vmatpush3.msra.mxu0 %v1143_v54  ;;  %3271 = vmatpush3.msra.mxu1 %v1159_v55 }
  0xd3   : > { %3237 = vmatprep.subr.mxu0 %v3492_v2  ;;  %3272 = vmatprep.subr.mxu1 %v3492_v2 }
  0xd4   : > { %3238 = vmatpush3.msra.mxu0 %v1142_v56  ;;  %3273 = vmatpush3.msra.mxu1 %v1158_v57 }
  0xd5   : > { %3239 = vmatprep.subr.mxu0 %v3492_v2  ;;  %3274 = vmatprep.subr.mxu1 %v3492_v2 }
  0xd6   : > { %3240 = vmatpush3.msra.mxu0 %v1141_v58  ;;  %3275 = vmatpush3.msra.mxu1 %v1157_v59 }
  0xd7   : > { %3241 = vmatprep.subr.mxu0 %v3492_v2  ;;  %3276 = vmatprep.subr.mxu1 %v3492_v2 }
  0xd8   : > { %3242 = vmatpush3.msra.mxu0 %v1140_v60  ;;  %3277 = vmatpush3.msra.mxu1 %v1156_v61 }
  0xd9   : > { %3243 = vmatprep.subr.mxu0 %v3492_v2  ;;  %3278 = vmatprep.subr.mxu1 %v3492_v2 }
  0xda   : > { %3244 = vmatpush3.msra.mxu0 %v1139_v62  ;;  %3279 = vmatpush3.msra.mxu1 %v1155_v63  ;;  %v1801_v63 = vlaneseq }
  0xdb   : > { %3245 = vmatprep.subr.mxu0 %v3492_v2  ;;  %3280 = vmatprep.subr.mxu1 %v3492_v2 }
  0xdc   : > { %3246 = vmatpush3.msra.mxu0 %v1138_v0  ;;  %3281 = vmatpush3.msra.mxu1 %v1154_v1  ;;  %v1802_v0 = vshrl.u32 %v1801_v63, 7  ;;  %v1804_v1 = vand.u32 127, %v1801_v63 }
  0xdd   : > { %3247 = vmatprep.subr.mxu0 %v3492_v2  ;;  %3282 = vmatprep.subr.mxu1 %v3492_v2 }
  0xde   : > { %3248 = vmatpush3.msra.mxu0 %v1137_v3  ;;  %3283 = vmatpush3.msra.mxu1 %v1153_v4  ;;  %v1805_v3 = vsub.s32 %v1802_v0, %v1804_v1 }
  0xdf   : > { %3249 = vmatprep.subr.mxu0 %v3492_v2  ;;  %3284 = vmatprep.subr.mxu1 %v3492_v2 }
  0xe0   : > { %3250 = vmatpush3.msra.mxu0 %v1136_v5  ;;  %3251 = vmatprep.mubr.msk.f32.mxu0 %vm3493_vm0, %v3492_v2  ;;  %v1807_v4 = vsub.s32 0, %v1805_v3 }
  0xe1   : > { %3285 = vmatpush3.msra.mxu1 %v1152_v6  ;;  %3286 = vmatprep.mubr.msk.f32.mxu1 %vm3493_vm0, %v3492_v2  ;;  %v1811_v6 = vstv %s1810_s15  ;;  %s352_s15 = scalar_lea.vmem [#allocation4], %s2593_s26 }
  0xe2   : > { %3252 = vmatmul.mubr.f32.vlgmr.msra.gmra.mxu0 %v3737_v33  ;;  %3287 = vmatmul.mubr.f32.vlgmr.msra.gmra.mxu1 %v3737_v33  ;;  %v2599_v33 = vld [vmem:[%s4638_s7] ss:$0 sm:$0xff]  ;;  %v2615_v5 = vmin.u32 %v1807_v4, %v1805_v3  ;;  %vm1812_vm3 = vcmp.eq.s32.totalorder %v1802_v0, %v1811_v6  ;;  %vm1814_vm5 = vcmp.eq.s32.totalorder %v1804_v1, %v1811_v6  ;;  %s2530_s25 = sshll.u32 %s352_s15, 4  ;;  %s2531_s25 = int_to_ptr.vmem [resolvable:$true] %s2530_s25 }
  0xe3   : > { %3289 = vmatprep.subr.mxu0 %v3492_v2  ;;  %3294 = vmatprep.subr.mxu1 %v3492_v2  ;;  %s3430_s1 = scalar_lea.vmem %s2531_s25, 128  ;;  %p3437_p0 = scmp.lt.s32.totalorder %s2531_s25, %s3435_s13 }
  0xe4   : > { %3291 = vmatprep.mubr.msk.f32.mxu0 %vm3493_vm0, %v3492_v2  ;;  %3296 = vmatprep.mubr.msk.f32.mxu1 %vm3493_vm0, %v3492_v2  ;;  %vm1809_vm2 = vcmp.le.s32.totalorder %v2615_v5, 2  ;;  %p3431_p11 = scmp.ne.s32.totalorder %s2531_s25, %s3430_s1  ;;  %p3438_p1 = scmp.lt.s32.totalorder %s3436_s0, %s3430_s1 }
  0xe5   : > { %vm1813_vm4 = vmor %vm1809_vm2, %vm1812_vm3 }
  0xe6   : > { %vm4479_vm6 = vmor %vm1813_vm4, %vm1814_vm5  ;;  %p3432_p12 = pnand %p3431_p11, %p3596_p5  ;;  %p3439_p2 = por %p3438_p1, %p3437_p0 }
  0xe8   : > { %p3433_p13 = pneg %p3432_p12 }
  0xea   : > { %p3440_p3 = pnand %p3439_p2, %p3433_p13 }
  0xf7   : > { %v518_v7 = vpop.f32.mrf.mxu0 }
  0xf8   : > { %v519_v28 = vadd.f32 %v2595_v24, %v518_v7 }
  0xf9   : > { %v2903_v8 = vpop.f32.mrf.mxu0  ;;  %v588_v9 = vpop.f32.mrf.mxu1 }
  0xfa   : > { %v589_v29 = vadd.f32 %v2596_v25, %v588_v9 }
  0xfb   : > { %v2938_v10 = vpop.f32.mrf.mxu1 }
 0x119   : > { %v658_v11 = vpop.f32.mrf.mxu0 }
 0x11a   : > { %v659_v45 = vadd.f32 %v2597_v41, %v658_v11 }
 0x11b   : > { %v2973_v12 = vpop.f32.mrf.mxu0  ;;  %v728_v13 = vpop.f32.mrf.mxu1 }
 0x11c   : > { %v729_v46 = vadd.f32 %v2598_v42, %v728_v13 }
 0x11d   : > { %v3008_v14 = vpop.f32.mrf.mxu1 }
 0x11e   : > { %v1830_v14 = vld [vmem:[%s4641_s10] sm:$0xff] }
 0x13c   : > { %v890_v16 = vpop.f32.mrf.mxu0  ;;  %v960_v17 = vpop.f32.mrf.mxu1 }
 0x13d   : > { %v891_v18 = vadd.f32 %v2599_v33, %v890_v16  ;;  %v961_v19 = vadd.f32 %v2600_v15, %v960_v17 }
 0x13e   : > { %v3043_v20 = vpop.f32.mrf.mxu0  ;;  %v3078_v21 = vpop.f32.mrf.mxu1 }
 0x13f   : > { %v1484_v22 = vpack.c.bf16 %v891_v18, %v891_v18  ;;  %v1485_v23 = vpack.c.bf16 %v961_v19, %v961_v19 }
 0x141   : > { %v1488_v26 = vunpack.c.l.bf16 %v1484_v22  ;;  %v1489_v27 = vunpack.c.l.bf16 %v1485_v23 }
 0x143   : > { %3290 = vmatpush3.xpose.msk.msra.mxu0 %vm1492_vm1, %v1488_v26  ;;  %3295 = vmatpush3.xpose.msk.msra.mxu1 %vm1492_vm1, %v1489_v27 }
 0x144   : > { %3299 = vmatprep.subr.mxu0 %v3492_v2  ;;  %3304 = vmatprep.subr.mxu1 %v3492_v2 }
 0x146   : > { %3292 = vmatmul.mubr.msk.f32.vlgmr.msra.gmra.mxu0 %vm1492_vm1, %v519_v28  ;;  %3297 = vmatmul.mubr.msk.f32.vlgmr.msra.gmra.mxu1 %vm1492_vm1, %v589_v29 }
 0x147   : > { %3301 = vmatprep.mubr.msk.f32.mxu0 %vm3493_vm0, %v3492_v2  ;;  %3306 = vmatprep.mubr.msk.f32.mxu1 %vm3493_vm0, %v3492_v2 }
 0x15e   : > { %v1030_v32 = vpop.f32.mrf.mxu0  ;;  %v1100_v34 = vpop.f32.mrf.mxu1 }
 0x15f   : > { %v1031_v35 = vadd.f32 %v2601_v30, %v1030_v32  ;;  %v1101_v36 = vadd.f32 %v2602_v31, %v1100_v34 }
 0x160   : > { %v3113_v37 = vpop.f32.mrf.mxu0  ;;  %v3148_v38 = vpop.f32.mrf.mxu1 }
 0x161   : > { %v1486_v39 = vpack.c.bf16 %v1031_v35, %v1031_v35  ;;  %v1487_v40 = vpack.c.bf16 %v1101_v36, %v1101_v36 }
 0x163   : > { %v1490_v43 = vunpack.c.l.bf16 %v1486_v39  ;;  %v1491_v44 = vunpack.c.l.bf16 %v1487_v40 }
 0x165   : > { %3300 = vmatpush3.xpose.msk.msra.mxu0 %vm1492_vm1, %v1490_v43  ;;  %3305 = vmatpush3.xpose.msk.msra.mxu1 %vm1492_vm1, %v1491_v44 }
 0x166   : > { %3309 = vmatprep.subr.mxu0 %v3492_v2  ;;  %3314 = vmatprep.subr.mxu1 %v3492_v2 }
 0x168   : > { %3302 = vmatmul.mubr.msk.f32.vlgmr.msra.gmra.mxu0 %vm1492_vm1, %v659_v45  ;;  %3307 = vmatmul.mubr.msk.f32.vlgmr.msra.gmra.mxu1 %vm1492_vm1, %v729_v46 }
 0x169   : > { %3311 = vmatprep.mubr.msk.f32.mxu0 %vm3493_vm0, %v3492_v2  ;;  %3316 = vmatprep.mubr.msk.f32.mxu1 %vm3493_vm0, %v3492_v2 }
 0x181   : > { %v1262_v49 = vpop.f32.mrf.mxu0  ;;  %v1332_v50 = vpop.f32.mrf.mxu1 }
 0x182   : > { %v1263_v51 = vadd.f32 %v2603_v47, %v1262_v49  ;;  %v1333_v52 = vadd.f32 %v2604_v48, %v1332_v50 }
 0x183   : > { %v3183_v53 = vpop.f32.mrf.mxu0  ;;  %v3218_v54 = vpop.f32.mrf.mxu1 }
 0x184   : > { %v1888_v55 = vpack.c.bf16 %v1263_v51, %v1263_v51  ;;  %v1889_v56 = vpack.c.bf16 %v1333_v52, %v1333_v52 }
 0x186   : > { %v1892_v57 = vunpack.c.l.bf16 %v1888_v55  ;;  %v1893_v58 = vunpack.c.l.bf16 %v1889_v56  ;;  %v2605_v55 = vld [vmem:[%s4639_s8 + $0x2] ss:$0 sm:$0xff] }
 0x188   : > { %3310 = vmatpush3.msra.mxu0 %v1892_v57  ;;  %3315 = vmatpush3.msra.mxu1 %v1893_v58  ;;  %v2606_v57 = vld [vmem:[%s4639_s8 + $0x3] ss:$0 sm:$0xff] }
 0x189   : > { %3319 = vmatprep.subr.mxu0 %v3492_v2  ;;  %3324 = vmatprep.subr.mxu1 %v3492_v2 }
 0x1a2   : > { %v4475_v59 = vpop.f32.mrf.mxu0  ;;  %v4477_v60 = vpop.f32.mrf.mxu1 }
 0x1a3   : > { %v1403_v56 = vadd.f32 %v2605_v55, %v4475_v59 }
 0x1a4   : > { %v3253_v61 = vpop.f32.mrf.mxu0  ;;  %v3288_v62 = vpop.f32.mrf.mxu1 }
 0x1a5   : > { %v1890_v58 = vpack.c.bf16 %v1403_v56, %v1403_v56  ;;  %v1473_v61 = vadd.f32 %v2606_v57, %v4477_v60 }
 0x1a7   : > { %v1894_v0 = vunpack.c.l.bf16 %v1890_v58  ;;  %v1891_v1 = vpack.c.bf16 %v1473_v61, %v1473_v61 }
 0x1a9   : > { %v1895_v59 = vunpack.c.l.bf16 %v1891_v1 }
 0x206   : > { %v1565_v7 = vpop.f32.mrf.mxu0  ;;  %v1641_v8 = vpop.f32.mrf.mxu1 }
 0x207   : > { %v1797_v9 = vmul.f32 0.17677669, %v1565_v7  ;;  %v1798_v11 = vmul.f32 0.17677669, %v1641_v8  ;;  %v2199_v8 = vld [vmem:[%s4636_s5 + $0x18] sm:$0xff] }
 0x208   : > { %v3293_v12 = vpop.f32.mrf.mxu0  ;;  %v3298_v13 = vpop.f32.mrf.mxu1 }
 0x209   : > { %vm1816_vm7 = vcmp.gt.f32.partialorder %v1797_v9, 0.0  ;;  %vm1817_vm8 = vcmp.gt.f32.partialorder %v1798_v11, 0.0  ;;  %v2197_v12 = vld [vmem:[%s4636_s5 + $0x8] sm:$0xff]  ;;  %v2203_v13 = vld [vmem:[%s4636_s5 + $0x38] sm:$0xff] }
 0x20a   : > { %vm1822_vm9 = vmand %vm4479_vm6, %vm1816_vm7 }
 0x20b   : > { %v1826_v33 = vsel %vm1822_vm9, %v1797_v9, -1e+30  ;;  %vm1823_vm10 = vmand %vm4479_vm6, %vm1817_vm8  ;;  %v2198_v9 = vld [vmem:[%s4636_s5 + $0x10] sm:$0xff] }
 0x20c   : > { %v1827_v15 = vsel %vm1823_vm10, %v1798_v11, -1e+30  ;;  %v1831_v16 = vadd.f32 %v1830_v14, %v1826_v33  ;;  %v2202_v33 = vld [vmem:[%s4636_s5 + $0x30] sm:$0xff] }
 0x20d   : > { %v1832_v18 = vadd.f32 %v1830_v14, %v1827_v15  ;;  %v2201_v15 = vld [vmem:[%s4636_s5 + $0x28] sm:$0xff] }
 0x20e   : > { %v1836_v17 = vsel %vm1835_vm11, %v1831_v16, -inf }
 0x20f   : > { %1837 = vmax.xlane.f32.xlu0 %v1836_v17  ;;  %v1839_v19 = vsel %vm1835_vm11, %v1832_v18, -inf  ;;  %v2207_v17 = vld [vmem:[%s4636_s5 + $0x58] sm:$0xff] }
 0x213   : > { %1840 = vmax.xlane.f32.xlu0 %v1839_v19  ;;  %v2206_v19 = vld [vmem:[%s4636_s5 + $0x50] sm:$0xff] }
 0x228   : > { %v1717_v20 = vpop.f32.mrf.mxu0  ;;  %v1793_v21 = vpop.f32.mrf.mxu1 }
 0x229   : > { %v1799_v22 = vmul.f32 0.17677669, %v1717_v20  ;;  %v1800_v23 = vmul.f32 0.17677669, %v1793_v21  ;;  %v2205_v21 = vld [vmem:[%s4636_s5 + $0x48] sm:$0xff] }
 0x22a   : > { %v3303_v24 = vpop.f32.mrf.mxu0  ;;  %v3308_v25 = vpop.f32.mrf.mxu1 }
 0x22b   : > { %vm1818_vm12 = vcmp.gt.f32.partialorder %v1799_v22, 0.0  ;;  %vm1819_vm13 = vcmp.gt.f32.partialorder %v1800_v23, 0.0  ;;  %v2204_v24 = vld [vmem:[%s4636_s5 + $0x40] sm:$0xff]  ;;  %v2210_v25 = vld [vmem:[%s4636_s5 + $0x70] sm:$0xff] }
 0x22c   : > { %vm1824_vm14 = vmand %vm4479_vm6, %vm1818_vm12 }
 0x22d   : > { %v1828_v26 = vsel %vm1824_vm14, %v1799_v22, -1e+30  ;;  %vm1825_vm15 = vmand %vm4479_vm6, %vm1819_vm13  ;;  %v2211_v22 = vld [vmem:[%s4636_s5 + $0x78] sm:$0xff] }
 0x22e   : > { %v1829_v27 = vsel %vm1825_vm15, %v1800_v23, -1e+30  ;;  %v1833_v28 = vadd.f32 %v1830_v14, %v1828_v26 }
 0x22f   : > { %v1834_v30 = vadd.f32 %v1830_v14, %v1829_v27  ;;  %v2196_v14 = vld [vmem:[%s4636_s5] sm:$0xff]  ;;  %v2209_v27 = vld [vmem:[%s4636_s5 + $0x68] sm:$0xff] }
 0x230   : > { %v1842_v29 = vsel %vm1835_vm11, %v1833_v28, -inf }
 0x231   : > { %1843 = vmax.xlane.f32.xlu1 %v1842_v29  ;;  %v1845_v31 = vsel %vm1835_vm11, %v1834_v30, -inf }
 0x235   : > { %1846 = vmax.xlane.f32.xlu1 %v1845_v31 }
 0x298   : > { %v1838_v32 = vpop.xlane.xlu0 %1837 }
 0x299   : > { %v1848_v34 = vsub.f32 %v1831_v16, %v1838_v32  ;;  %v2200_v16 = vld [vmem:[%s4636_s5 + $0x20] sm:$0xff] }
 0x29b   : > { %v1852_v35 = vmul.f32 1.442695, %v1848_v34 }
 0x29c   : > { %v1841_v36 = vpop.xlane.xlu0 %1840 }
 0x29d   : > { %3414 = vpow2.f32 %v1852_v35  ;;  %v1849_v37 = vsub.f32 %v1832_v18, %v1841_v36 }
 0x29f   : > { %v1854_v38 = vmul.f32 1.442695, %v1849_v37 }
 0x2a1   : > { %3416 = vpow2.f32 %v1854_v38 }
 0x2aa   : > { %v3415_v39 = vpop.eup %3414 }
 0x2ab   : > { %v1860_v40 = vsel %vm1835_vm11, %v3415_v39, 0.0 }
 0x2ac   : > { %1861 = vadd.xlane.f32.xlu0 %v1860_v40 }
 0x2ae   : > { %v3417_v41 = vpop.eup %3416 }
 0x2af   : > { %v1863_v42 = vsel %vm1835_vm11, %v3417_v41, 0.0 }
 0x2b0   : > { %1864 = vadd.xlane.f32.xlu1 %v1863_v42  ;;  %v2624_v42 = vld [vmem:[%s4640_s9] ss:$0 sm:$0xff] }
 0x2ba   : > { %v1844_v43 = vpop.xlane.xlu1 %1843 }
 0x2bb   : > { %v1850_v44 = vsub.f32 %v1833_v28, %v1844_v43  ;;  %v2208_v28 = vld [vmem:[%s4636_s5 + $0x60] sm:$0xff] }
 0x2bd   : > { %v1856_v45 = vmul.f32 1.442695, %v1850_v44 }
 0x2be   : > { %v1847_v46 = vpop.xlane.xlu1 %1846 }
 0x2bf   : > { %3418 = vpow2.f32 %v1856_v45  ;;  %v1851_v47 = vsub.f32 %v1834_v30, %v1847_v46 }
 0x2c1   : > { %v1858_v48 = vmul.f32 1.442695, %v1851_v47 }
 0x2c3   : > { %3420 = vpow2.f32 %v1858_v48 }
 0x2cc   : > { %v3419_v49 = vpop.eup %3418 }
 0x2cd   : > { %v1866_v50 = vsel %vm1835_vm11, %v3419_v49, 0.0 }
 0x2ce   : > { %1867 = vadd.xlane.f32.xlu0 %v1866_v50 }
 0x2d0   : > { %v3421_v51 = vpop.eup %3420 }
 0x2d1   : > { %v1869_v52 = vsel %vm1835_vm11, %v3421_v51, 0.0 }
 0x2d2   : > { %1870 = vadd.xlane.f32.xlu1 %v1869_v52 }
 0x335   : > { %v1862_v53 = vpop.xlane.xlu0 %1861 }
 0x336   : > { %3422 = vrcp.f32 %v1862_v53 }
 0x339   : > { %v1865_v54 = vpop.xlane.xlu1 %1864 }
 0x33a   : > { %3424 = vrcp.f32 %v1865_v54 }
 0x343   : > { %v3423_v62 = vpop.eup %3422 }
 0x344   : > { %v1873_v63 = vmul.f32 %v3423_v62, %v3415_v39 }
 0x346   : > { %3312 = vmatmul.mubr.msk.f32.vlgmr.msra.gmra.mxu0 %vm1835_vm11, %v1873_v63 }
 0x347   : > { %v3425_v3 = vpop.eup %3424  ;;  %3320 = vmatpush3.msra.mxu0 %v1894_v0  ;;  %3321 = vmatprep.mubr.msk.f32.mxu0 %vm3493_vm0, %v3492_v2 }
 0x348   : > { %v1875_v4 = vmul.f32 %v3425_v3, %v3417_v41  ;;  %3329 = vmatprep.subr.mxu0 %v3492_v2 }
 0x34a   : > { %3317 = vmatmul.mubr.msk.f32.vlgmr.msra.gmra.mxu1 %vm1835_vm11, %v1875_v4 }
 0x34b   : > { %3325 = vmatpush3.msra.mxu1 %v1895_v59  ;;  %3326 = vmatprep.mubr.msk.f32.mxu1 %vm3493_vm0, %v3492_v2 }
 0x34c   : > { %3340 = vmatprep.subr.mxu1 %v3492_v2 }
 0x357   : > { %v1868_v60 = vpop.xlane.xlu0 %1867 }
 0x358   : > { %3426 = vrcp.f32 %v1868_v60 }
 0x35b   : > { %v1871_v5 = vpop.xlane.xlu1 %1870 }
 0x35c   : > { %3428 = vrcp.f32 %v1871_v5 }
 0x365   : > { %v3427_v6 = vpop.eup %3426 }
 0x366   : > { %v1877_v7 = vmul.f32 %v3427_v6, %v3419_v49 }
 0x368   : > { %3322 = vmatmul.mubr.msk.f32.vlgmr.msra.gmra.mxu0 %vm1835_vm11, %v1877_v7 }
 0x369   : > { %v3429_v10 = vpop.eup %3428  ;;  %3330 = vmatpush3.msra.mxu0 %v2199_v8  ;;  %3337 = vmatprep.mubr.msk.f32.mxu0 %vm3493_vm0, %v3492_v2 }
 0x36a   : > { %v1879_v11 = vmul.f32 %v3429_v10, %v3421_v51  ;;  %3331 = vmatprep.subr.mxu0 %v3492_v2 }
 0x36b   : > { %3332 = vmatpush3.msra.mxu0 %v2198_v9 }
 0x36c   : > { %3327 = vmatmul.mubr.msk.f32.vlgmr.msra.gmra.mxu1 %vm1835_vm11, %v1879_v11  ;;  %3333 = vmatprep.subr.mxu0 %v3492_v2 }
 0x36d   : > { %3334 = vmatpush3.msra.mxu0 %v2197_v12  ;;  %3341 = vmatpush3.msra.mxu1 %v2203_v13 }
 0x36e   : > { %3335 = vmatprep.subr.mxu0 %v3492_v2  ;;  %3342 = vmatprep.subr.mxu1 %v3492_v2 }
 0x36f   : > { %3348 = vmatprep.mubr.msk.f32.mxu1 %vm3493_vm0, %v3492_v2  ;;  %3336 = vmatpush3.msra.mxu0 %v2196_v14 }
 0x370   : > { %3343 = vmatpush3.msra.mxu1 %v2202_v33  ;;  %3351 = vmatprep.subr.mxu0 %v3492_v2 }
 0x371   : > { %3344 = vmatprep.subr.mxu1 %v3492_v2 }
 0x372   : > { %3345 = vmatpush3.msra.mxu1 %v2201_v15 }
 0x373   : > { %3346 = vmatprep.subr.mxu1 %v3492_v2 }
 0x374   : > { %3347 = vmatpush3.msra.mxu1 %v2200_v16 }
 0x375   : > { %3362 = vmatprep.subr.mxu1 %v3492_v2 }
 0x406   : > { %v1965_v18 = vpop.f32.mrf.mxu0 }
 0x407   : > { %3338 = vmatmul.mubr.msk.f32.vlgmr.msra.gmra.mxu0 %vm1492_vm1, %v1965_v18 }
 0x408   : > { %v3313_v20 = vpop.f32.mrf.mxu0  ;;  %3352 = vmatpush3.msra.mxu0 %v2207_v17  ;;  %3359 = vmatprep.mubr.msk.f32.mxu0 %vm3493_vm0, %v3492_v2 }
 0x409   : > { %3353 = vmatprep.subr.mxu0 %v3492_v2 }
 0x40a   : > { %v2038_v23 = vpop.f32.mrf.mxu1  ;;  %3354 = vmatpush3.msra.mxu0 %v2206_v19 }
 0x40b   : > { %3349 = vmatmul.mubr.msk.f32.vlgmr.msra.gmra.mxu1 %vm1492_vm1, %v2038_v23  ;;  %3355 = vmatprep.subr.mxu0 %v3492_v2 }
 0x40c   : > { %v3318_v26 = vpop.f32.mrf.mxu1  ;;  %3356 = vmatpush3.msra.mxu0 %v2205_v21  ;;  %3363 = vmatpush3.msra.mxu1 %v2211_v22 }
 0x40d   : > { %3357 = vmatprep.subr.mxu0 %v3492_v2  ;;  %3364 = vmatprep.subr.mxu1 %v3492_v2 }
 0x40e   : > { %3358 = vmatpush3.msra.mxu0 %v2204_v24  ;;  %3365 = vmatpush3.msra.mxu1 %v2210_v25 }
 0x40f   : > { %3366 = vmatprep.subr.mxu1 %v3492_v2  ;;  %3370 = vmatprep.mubr.msk.f32.mxu1 %vm3493_vm0, %v3492_v2 }
 0x410   : > { %3367 = vmatpush3.msra.mxu1 %v2209_v27 }
 0x411   : > { %3368 = vmatprep.subr.mxu1 %v3492_v2 }
 0x412   : > { %3369 = vmatpush3.msra.mxu1 %v2208_v28 }
 0x428   : > { %v2111_v29 = vpop.f32.mrf.mxu0 }
 0x429   : > { %3360 = vmatmul.mubr.msk.f32.vlgmr.msra.gmra.mxu0 %vm1492_vm1, %v2111_v29 }
 0x42a   : > { %v3323_v30 = vpop.f32.mrf.mxu0 }
 0x42c   : > { %v2184_v31 = vpop.f32.mrf.mxu1 }
 0x42d   : > { %3371 = vmatmul.mubr.msk.f32.vlgmr.msra.gmra.mxu1 %vm1492_vm1, %v2184_v31 }
 0x42e   : > { %v3328_v32 = vpop.f32.mrf.mxu1 }
 0x4c7   : > { %v2281_v34 = vpop.f32.mrf.mxu0 }
 0x4c9   : > { %v3339_v35 = vpop.f32.mrf.mxu0 }
 0x4cb   : > { %v2354_v36 = vpop.f32.mrf.mxu1 }
 0x4cc   : > { %v2504_v39 = vadd.f32 %v2354_v36, %v2281_v34 }
 0x4cd   : > { %v3350_v37 = vpop.f32.mrf.mxu1 }
 0x4e9   : > { %v2427_v38 = vpop.f32.mrf.mxu0 }
 0x4ea   : > { %v2505_v2 = vadd.f32 %v2504_v39, %v2427_v38 }
 0x4eb   : > { %v3361_v40 = vpop.f32.mrf.mxu0 }
 0x4ed   : > { %v2500_v41 = vpop.f32.mrf.mxu1 }
 0x4ee   : > { %v2506_v43 = vadd.f32 %v2505_v2, %v2500_v41 }
 0x4ef   : > { %v3372_v44 = vpop.f32.mrf.mxu1 }
 0x4f0   : > { %v2514_v45 = vadd.f32 %v2624_v42, %v2506_v43 }
 0x4f2   : > { %2515 = vst [vmem:[%s352_s15] sm:$0xff] %v2514_v45 }
 0x4f3   : > { %3443 = shalt.err (!%p3440_p3)
}
 0x4f4   : > { %s3444_s26 = scalar_lea.hbm %s2528_s17, 128  ;;  %s3448_s15 = scalar_lea.hbm %s4642_s11, 256 }
 0x4f5   : > { %p3445_p4 = scmp.ne.s32.totalorder %s2528_s17, %s3444_s26  ;;  %p3449_p9 = scmp.lt.s32.totalorder %s2528_s17, %s4642_s11 }
 0x4f6   : > { %p3450_p10 = scmp.lt.s32.totalorder %s3448_s15, %s3444_s26 }
 0x4f7   : > { %p3446_p7 = pnand %p3445_p4, %p3596_p5 }
 0x4f8   : > { %p3451_p11 = por %p3450_p10, %p3449_p9 }
 0x4f9   : > { %p3447_p8 = pneg %p3446_p7 }
 0x4fb   : > { %p3452_p12 = pnand %p3451_p11, %p3447_p8 }
 0x4fd   : > { %3455 = shalt.err (!%p3452_p12)
}
 0x4fe   : > { %3373 = dma.vmem_to_hbm [thread:$0]  (%p3596_p5), %s2531_s25, 128, %s2528_s17, %s2517_s18  }
 0x4ff PF: > { %p3379_p13 = scmp.ge.s32.totalorder %s3490_s22, 2  ;;  %s2542_s1 = sand.u32 1, %s3478_s19  }
 0x500   : > { %s2543_s12 = scalar_lea.sflag [#allocation5], %s2542_s1 }
 0x501   : > { %p3376_p0 = pnand %p3379_p13, %p3600_p6 }
 0x503   : > { %p3377_p1 = pneg %p3376_p0 }
 0x505   : > { %3473 = dma.done.wait (%p3377_p1), %s2543_s12, 128  }
 0x506   : > { %3475 = vsyncadd (%p3377_p1), %s2543_s12, 4294967168  ;;  %p22_p2 = scmp.ge.s32.totalorder %s3583_s24, 4   ;;  %s4649_s19 = smov %s3482_s20 }
 0x507   : > { %s4650_s20 = smov %s3486_s21  ;;  %s4651_s21 = smov %s3594_s27 }
 0x508   : > { %s4652_s22 = smov %s3583_s24  ;;  %24 = sbr.rel (!%p22_p2) target bundleno = 6 (0x6), region = 95 }
 0x50d   :  { %2548 = vsyncpa [#allocation5], 1 }
 0x50e   :  { %2550 = vsyncpa [#allocation5 + $0x1], 1 }

</bundles_post_ra>
